<compile_context>
chip_gen: v6e
topology: v6e:2x2x1
jax: 0.10.0
libtpu: 0.0.40
codegen_flags: <defaults>
</compile_context>

<pallas_src>
import jax
import jax.numpy as jnp
from jax.experimental import pallas as pl
from jax.experimental.pallas import tpu as pltpu


# ---------------------------------------------------------------------------
# Pass 1: banded-matmul 3x3 conv (bf16 MXU, f32 accum) + per-tile BN sums.
# ---------------------------------------------------------------------------
def _conv_stats_kernel(x_ref, wb_ref, conv_ref, stat_ref, xp_ref):
    # x_ref   : (TB, H, W*Cin)      f32 batch-tile of the NHWC input (lane-dense)
    # wb_ref  : (3, W*Cin, W*Cout)  bf16 banded conv weights (constant block)
    # conv_ref: (TB*H, W*Cout)      bf16 conv output tile (lane-dense)
    # stat_ref: (1, 2, W*Cout)      f32 per-tile [sum, sum-of-squares]
    # xp_ref  : (TB, H+2, W*Cin)    f32 VMEM scratch, H-padded copy of the input
    TB, H, WCin = x_ref.shape
    WCout = conv_ref.shape[-1]

    # In-kernel zero padding along H only (the dx padding lives inside the
    # banded weight).  f32 scratch -> all +-1-row slices are sublane-native.
    zrow = jnp.zeros((TB, 1, WCin), jnp.float32)
    xp_ref[:, 0:1, :] = zrow
    xp_ref[:, H + 1:H + 2, :] = zrow
    xp_ref[:, 1:H + 1, :] = x_ref[...]

    # 3x3 conv as 3 lane-dense matmuls (one per dy tap): K = W*Cin, N = W*Cout,
    # M = TB*H.  bf16 operands on the MXU, f32 accumulation.  The first dot
    # initializes the accumulator (no zero-fill pass).
    lhs0 = xp_ref[:, 0:H, :].reshape(TB * H, WCin).astype(jnp.bfloat16)
    lhs1 = x_ref[...].reshape(TB * H, WCin).astype(jnp.bfloat16)          # dy = 1
    lhs2 = xp_ref[:, 2:H + 2, :].reshape(TB * H, WCin).astype(jnp.bfloat16)

    acc = jnp.dot(lhs0, wb_ref[0], preferred_element_type=jnp.float32)
    acc = acc + jnp.dot(lhs1, wb_ref[1], preferred_element_type=jnp.float32)
    acc = acc + jnp.dot(lhs2, wb_ref[2], preferred_element_type=jnp.float32)

    # bf16 inter-pass intermediate (stats below use the exact f32 accumulator).
    conv_ref[...] = acc.astype(conv_ref.dtype)

    # Partial BN statistics in the lane-dense (w, c) layout, written directly.
    stat_ref[:, 0, :] = jnp.sum(acc, axis=0, keepdims=True)
    stat_ref[:, 1, :] = jnp.sum(acc * acc, axis=0, keepdims=True)


# ---------------------------------------------------------------------------
# Pass 2: y = LeakyReLU(conv * scale + shift) on lane-dense row tiles.
# ---------------------------------------------------------------------------
def _bn_lrelu_kernel(conv_ref, scale_ref, shift_ref, o_ref):
    y = conv_ref[...].astype(jnp.float32) * scale_ref[...] + shift_ref[...]
    o_ref[...] = jnp.where(y >= 0.0, y, 0.01 * y)


# ---------------------------------------------------------------------------
# Weight preparation (hoisted out of the jitted forward; call once per update).
# ---------------------------------------------------------------------------
def make_banded_weights(w_oihw, width):
    """(Cout, Cin, 3, 3) OIHW -> (3, W*Cin, W*Cout) block-banded bf16 matrices.

    For each dy tap, Wband[dy][(xs, ci), (xo, co)] = w[dy, dx, ci, co] where
    xs = xo + dx - 1; out-of-range xs are absent (== zero padding in x).
    """
    w_hwio = jnp.transpose(w_oihw, (2, 3, 1, 0)).astype(jnp.float32)  # (3,3,Cin,Cout)
    bands = []
    for dy in range(3):
        band = jnp.zeros((width * w_hwio.shape[2], width * w_hwio.shape[3]),
                         jnp.float32)
        for dx in range(3):
            sel = jnp.eye(width, k=1 - dx, dtype=jnp.float32)  # ones at xs = xo+dx-1
            band = band + jnp.kron(sel, w_hwio[dy, dx])
        bands.append(band)
    return jnp.stack(bands).astype(jnp.bfloat16)  # (3, W*Cin, W*Cout) bf16


def _pick_batch_tile(n, h, row_target=512):
    """Largest divisor of n with TB*H <= row_target, preferring >=2 grid steps."""
    cap = max(1, row_target // max(h, 1))
    divs = [d for d in range(1, n + 1) if n % d == 0 and d <= cap]
    multi = [d for d in divs if n // d >= 2]          # keep both v7x cores busy
    return max(multi) if multi else max(divs)
    # TODO(synk): mask ragged batch tiles so non-divisor TB (e.g. large prime N)
    # can also use big M without polluting the BN statistics.


def _pick_row_tile(rows, cap=1024):
    if rows <= 16:
        return rows
    # multiple of 16 (bf16 sublane packing), >= 2 grid steps when possible.
    return min(cap, max(16, ((rows + 1) // 2) // 16 * 16))


# ---------------------------------------------------------------------------
# Forward: NCHW input, prebuilt banded bf16 weights -> NCHW output (f32).
# ---------------------------------------------------------------------------
@jax.jit
def load_kernel_network_forward(x_nchw, wb_bf16, gamma, beta):
    N, Cin, H, W = x_nchw.shape
    WCin = W * Cin
    WCout = wb_bf16.shape[2]
    Cout = WCout // W
    rows = N * H

    # NCHW -> NHWC -> (N, H, W*Cin) lane-dense slab.  (An NHWC caller could
    # skip this transpose and the final one entirely.)
    x3 = jnp.transpose(x_nchw, (0, 2, 3, 1)).reshape(N, H, WCin).astype(jnp.float32)

    TB = _pick_batch_tile(N, H)      # M = TB*H rows per pass-1 matmul
    NT = N // TB

    # ---- Pass 1: conv tiles + per-tile sum / sumsq, grid over batch tiles ----
    conv2d, stats = pl.pallas_call(
        _conv_stats_kernel,
        out_shape=(jax.ShapeDtypeStruct((rows, WCout), jnp.bfloat16),
                   jax.ShapeDtypeStruct((NT, 2, WCout), jnp.float32)),
        grid=(NT,),
        in_specs=[pl.BlockSpec((TB, H, WCin), lambda b: (b, 0, 0)),
                  # constant index_map -> fetched once; single-buffering it
                  # (pipeline_mode=pl.Buffered(1)) would save one wb copy of
                  # VMEM when W*C grows (v7x), left out to keep lowering safe.
                  pl.BlockSpec((3, WCin, WCout), lambda b: (0, 0, 0))],
        out_specs=(pl.BlockSpec((TB * H, WCout), lambda b: (b, 0)),
                   pl.BlockSpec((1, 2, WCout), lambda b: (b, 0, 0))),
        scratch_shapes=[pltpu.VMEM((TB, H + 2, WCin), jnp.float32)],
        compiler_params=pltpu.CompilerParams(
            dimension_semantics=("parallel",),
            vmem_limit_bytes=32 * 1024 * 1024),
    )(x3, wb_bf16)

    # ---- Tiny (Cout,)-sized BN statistics finish (negligible XLA op) ----
    cnt = jnp.float32(N * H * W)
    s_c = jnp.sum(stats[:, 0, :], axis=0).reshape(W, Cout).sum(axis=0)
    sq_c = jnp.sum(stats[:, 1, :], axis=0).reshape(W, Cout).sum(axis=0)
    mean = s_c / cnt
    var = sq_c / cnt - mean * mean                 # biased variance (training BN)
    inv = jax.lax.rsqrt(var + 1e-5)
    scale_c = gamma.astype(jnp.float32) * inv
    shift_c = beta.astype(jnp.float32) - mean * scale_c
    scale_l = jnp.tile(scale_c, W).reshape(1, WCout)   # lane layout (w, c)
    shift_l = jnp.tile(shift_c, W).reshape(1, WCout)
    # TODO(synk): PyTorch training-mode BN also updates running_mean/running_var
    # module state; that side effect is not reproduced (forward activations only).

    # ---- Pass 2: normalize + LeakyReLU, grid over lane-dense row tiles ----
    TR = _pick_row_tile(rows)
    # Ragged last tile is safe: elementwise compute on padded reads, OOB writes
    # are masked by Pallas.
    y2d = pl.pallas_call(
        _bn_lrelu_kernel,
        out_shape=jax.ShapeDtypeStruct((rows, WCout), jnp.float32),
        grid=(pl.cdiv(rows, TR),),
        in_specs=[pl.BlockSpec((TR, WCout), lambda i: (i, 0)),
                  pl.BlockSpec((1, WCout), lambda i: (0, 0)),
                  pl.BlockSpec((1, WCout), lambda i: (0, 0))],
        out_specs=pl.BlockSpec((TR, WCout), lambda i: (i, 0)),
        compiler_params=pltpu.CompilerParams(dimension_semantics=("parallel",)),
    )(conv2d, scale_l, shift_l)

    # (N*H, W*Cout) -> NCHW (kept in the wrapper to honor the module's layout).
    return jnp.transpose(y2d.reshape(N, H, W, Cout), (0, 3, 1, 2))


def load_kernel_network_apply(x_nchw, w_oihw, bias, gamma, beta):
    """Convenience wrapper taking the torch module's raw parameters."""
    del bias  # exactly cancelled by the training-mode BN mean subtraction
    wb = make_banded_weights(w_oihw, x_nchw.shape[3])
    return load_kernel_network_forward(x_nchw, wb, gamma, beta)


# ---------------------------------------------------------------------------
# Pure-JAX reference (NCHW conv + bias + training-mode BN + LeakyReLU).
# ---------------------------------------------------------------------------
def _reference_forward(x_nchw, w_oihw, bias, gamma, beta):
    conv = jax.lax.conv_general_dilated(
        x_nchw, w_oihw, window_strides=(1, 1), padding=((1, 1), (1, 1)),
        dimension_numbers=("NCHW", "OIHW", "NCHW"))
    conv = conv + bias[None, :, None, None]
    mean = jnp.mean(conv, axis=(0, 2, 3), keepdims=True)
    var = jnp.mean(jnp.square(conv - mean), axis=(0, 2, 3), keepdims=True)
    xhat = (conv - mean) * jax.lax.rsqrt(var + 1e-5)
    y = xhat * gamma[None, :, None, None] + beta[None, :, None, None]
    return jnp.where(y >= 0.0, y, 0.01 * y)


if __name__ == "__main__":
    # Small shapes consistent with the module (Conv2d Cin -> Cout, 3x3, pad 1).
    N, C, H, W = 2, 32, 16, 16        # inchannel = outchannel = 32
    key = jax.random.PRNGKey(0)
    kx, kw, kb, kg, kbeta = jax.random.split(key, 5)

    x = jax.random.normal(kx, (N, C, H, W), dtype=jnp.float32)
    w = jax.random.normal(kw, (C, C, 3, 3), dtype=jnp.float32) * 0.1   # OIHW
    b = jax.random.normal(kb, (C,), dtype=jnp.float32) * 0.1           # conv bias
    gamma = 1.0 + 0.1 * jax.random.normal(kg, (C,), dtype=jnp.float32) # BN weight
    beta = 0.1 * jax.random.normal(kbeta, (C,), dtype=jnp.float32)     # BN bias

    # Banded weights built once (per weight update), outside the jitted forward.
    wb = make_banded_weights(w, W)
    out = jax.block_until_ready(load_kernel_network_forward(x, wb, gamma, beta))
    ref = jax.block_until_ready(_reference_forward(x, w, b, gamma, beta))

    assert out.shape == (N, C, H, W)
    # bf16 MXU operands + bf16 inter-pass intermediate -> loosened tolerance.
    assert jnp.allclose(out, ref, rtol=2e-2, atol=5e-2), "mismatch vs reference"

    print("KERNEL_OK")
</pallas_src>

<mosaic_0001>
module attributes {stable_mosaic.version = 11 : i64} {
  func.func @_conv_stats_kernel(%arg0: i32, %arg1: memref<1x16x512xf32, #tpu.memory_space<vmem>>, %arg2: memref<3x512x512xbf16, #tpu.memory_space<vmem>>, %arg3: memref<16x512xbf16, #tpu.memory_space<vmem>>, %arg4: memref<1x2x512xf32, #tpu.memory_space<vmem>>, %arg5: memref<1x18x512xf32, #tpu.memory_space<vmem>>) attributes {dimension_semantics = [#tpu.dimension_semantics<parallel>], iteration_bounds = array<i64: 2>, scalar_prefetch = 0 : i64, scratch_operands = 1 : i64, tpu.core_type = #tpu.core_type<tc>, window_params = [{transform_indices = @transform_0, window_bounds = array<i64: 1, 16, 512>}, {pipeline_mode = #tpu.pipeline_mode<synchronous>, transform_indices = @transform_1, window_bounds = array<i64: 3, 512, 512>}, {transform_indices = @transform_2, window_bounds = array<i64: 16, 512>}, {transform_indices = @transform_3, window_bounds = array<i64: 1, 2, 512>}]} {
    %cst = arith.constant 0.000000e+00 : f32
    %0 = vector.broadcast %cst : f32 to vector<1x1x512xf32>
    %c0 = arith.constant 0 : index
    %c0_0 = arith.constant 0 : index
    %c0_1 = arith.constant 0 : index
    %1 = vector.load %arg5[%c0, %c0_0, %c0_1] : memref<1x18x512xf32, #tpu.memory_space<vmem>>, vector<1x1x512xf32>
    tpu.vector_store %arg5[%c0, %c0_0, %c0_1], %0 {strides = array<i32>} : memref<1x18x512xf32, #tpu.memory_space<vmem>>, vector<1x1x512xf32>,
    %c0_2 = arith.constant 0 : index
    %c17 = arith.constant 17 : index
    %c0_3 = arith.constant 0 : index
    %2 = vector.load %arg5[%c0_2, %c17, %c0_3] : memref<1x18x512xf32, #tpu.memory_space<vmem>>, vector<1x1x512xf32>
    tpu.vector_store %arg5[%c0_2, %c17, %c0_3], %0 {strides = array<i32>} : memref<1x18x512xf32, #tpu.memory_space<vmem>>, vector<1x1x512xf32>,
    %c0_4 = arith.constant 0 : index
    %c0_5 = arith.constant 0 : index
    %c0_6 = arith.constant 0 : index
    %3 = vector.load %arg1[%c0_4, %c0_5, %c0_6] : memref<1x16x512xf32, #tpu.memory_space<vmem>>, vector<1x16x512xf32>
    %c0_7 = arith.constant 0 : index
    %c1 = arith.constant 1 : index
    %c0_8 = arith.constant 0 : index
    %4 = vector.load %arg5[%c0_7, %c1, %c0_8] : memref<1x18x512xf32, #tpu.memory_space<vmem>>, vector<1x16x512xf32>
    tpu.vector_store %arg5[%c0_7, %c1, %c0_8], %3 {strides = array<i32>} : memref<1x18x512xf32, #tpu.memory_space<vmem>>, vector<1x16x512xf32>,
    %c0_9 = arith.constant 0 : index
    %c0_10 = arith.constant 0 : index
    %c0_11 = arith.constant 0 : index
    %5 = vector.load %arg5[%c0_9, %c0_10, %c0_11] : memref<1x18x512xf32, #tpu.memory_space<vmem>>, vector<1x16x512xf32>
    %6 = vector.shape_cast %5 : vector<1x16x512xf32> to vector<16x512xf32>
    %7 = arith.truncf %6 : vector<16x512xf32> to vector<16x512xbf16>
    %c0_12 = arith.constant 0 : index
    %c0_13 = arith.constant 0 : index
    %c0_14 = arith.constant 0 : index
    %8 = vector.load %arg1[%c0_12, %c0_13, %c0_14] : memref<1x16x512xf32, #tpu.memory_space<vmem>>, vector<1x16x512xf32>
    %9 = vector.shape_cast %8 : vector<1x16x512xf32> to vector<16x512xf32>
    %10 = arith.truncf %9 : vector<16x512xf32> to vector<16x512xbf16>
    %c0_15 = arith.constant 0 : index
    %c2 = arith.constant 2 : index
    %c0_16 = arith.constant 0 : index
    %11 = vector.load %arg5[%c0_15, %c2, %c0_16] : memref<1x18x512xf32, #tpu.memory_space<vmem>>, vector<1x16x512xf32>
    %12 = vector.shape_cast %11 : vector<1x16x512xf32> to vector<16x512xf32>
    %13 = arith.truncf %12 : vector<16x512xf32> to vector<16x512xbf16>
    %c0_17 = arith.constant 0 : index
    %c0_18 = arith.constant 0 : index
    %c0_19 = arith.constant 0 : index
    %14 = vector.load %arg2[%c0_17, %c0_18, %c0_19] : memref<3x512x512xbf16, #tpu.memory_space<vmem>>, vector<1x512x512xbf16>
    %15 = vector.shape_cast %14 : vector<1x512x512xbf16> to vector<512x512xbf16>
    %cst_20 = arith.constant dense<0.000000e+00> : vector<16x512xf32>
    %16 = tpu.matmul %7, %15, %cst_20 {dimension_numbers = #tpu.dot_dimension_numbers<[1], [0], [0], [1], [0, 0, 1, 1], [], []>} : vector<16x512xbf16>, vector<512x512xbf16>, vector<16x512xf32> -> vector<16x512xf32>
    %c1_21 = arith.constant 1 : index
    %c0_22 = arith.constant 0 : index
    %c0_23 = arith.constant 0 : index
    %17 = vector.load %arg2[%c1_21, %c0_22, %c0_23] : memref<3x512x512xbf16, #tpu.memory_space<vmem>>, vector<1x512x512xbf16>
    %18 = vector.shape_cast %17 : vector<1x512x512xbf16> to vector<512x512xbf16>
    %cst_24 = arith.constant dense<0.000000e+00> : vector<16x512xf32>
    %19 = tpu.matmul %10, %18, %cst_24 {dimension_numbers = #tpu.dot_dimension_numbers<[1], [0], [0], [1], [0, 0, 1, 1], [], []>} : vector<16x512xbf16>, vector<512x512xbf16>, vector<16x512xf32> -> vector<16x512xf32>
    %20 = arith.addf %16, %19 : vector<16x512xf32>
    %c2_25 = arith.constant 2 : index
    %c0_26 = arith.constant 0 : index
    %c0_27 = arith.constant 0 : index
    %21 = vector.load %arg2[%c2_25, %c0_26, %c0_27] : memref<3x512x512xbf16, #tpu.memory_space<vmem>>, vector<1x512x512xbf16>
    %22 = vector.shape_cast %21 : vector<1x512x512xbf16> to vector<512x512xbf16>
    %cst_28 = arith.constant dense<0.000000e+00> : vector<16x512xf32>
    %23 = tpu.matmul %13, %22, %cst_28 {dimension_numbers = #tpu.dot_dimension_numbers<[1], [0], [0], [1], [0, 0, 1, 1], [], []>} : vector<16x512xbf16>, vector<512x512xbf16>, vector<16x512xf32> -> vector<16x512xf32>
    %24 = arith.addf %20, %23 : vector<16x512xf32>
    %25 = arith.truncf %24 : vector<16x512xf32> to vector<16x512xbf16>
    %c0_29 = arith.constant 0 : index
    %c0_30 = arith.constant 0 : index
    %26 = vector.load %arg3[%c0_29, %c0_30] : memref<16x512xbf16, #tpu.memory_space<vmem>>, vector<16x512xbf16>
    tpu.vector_store %arg3[%c0_29, %c0_30], %25 {strides = array<i32>} : memref<16x512xbf16, #tpu.memory_space<vmem>>, vector<16x512xbf16>,
    %cst_31 = arith.constant dense<0.000000e+00> : vector<512xf32>
    %27 = vector.multi_reduction <add>, %24, %cst_31 [0] : vector<16x512xf32> to vector<512xf32>
    %28 = vector.shape_cast %27 : vector<512xf32> to vector<1x512xf32>
    %c0_32 = arith.constant 0 : index
    %c0_33 = arith.constant 0 : index
    %c0_34 = arith.constant 0 : index
    %29 = vector.load %arg4[%c0_32, %c0_33, %c0_34] : memref<1x2x512xf32, #tpu.memory_space<vmem>>, vector<1x1x512xf32>
    %30 = vector.shape_cast %29 : vector<1x1x512xf32> to vector<1x512xf32>
    %31 = vector.shape_cast %28 : vector<1x512xf32> to vector<1x1x512xf32>
    tpu.vector_store %arg4[%c0_32, %c0_33, %c0_34], %31 {strides = array<i32>} : memref<1x2x512xf32, #tpu.memory_space<vmem>>, vector<1x1x512xf32>,
    %32 = arith.mulf %24, %24 : vector<16x512xf32>
    %cst_35 = arith.constant dense<0.000000e+00> : vector<512xf32>
    %33 = vector.multi_reduction <add>, %32, %cst_35 [0] : vector<16x512xf32> to vector<512xf32>
    %34 = vector.shape_cast %33 : vector<512xf32> to vector<1x512xf32>
    %c0_36 = arith.constant 0 : index
    %c1_37 = arith.constant 1 : index
    %c0_38 = arith.constant 0 : index
    %35 = vector.load %arg4[%c0_36, %c1_37, %c0_38] : memref<1x2x512xf32, #tpu.memory_space<vmem>>, vector<1x1x512xf32>
    %36 = vector.shape_cast %35 : vector<1x1x512xf32> to vector<1x512xf32>
    %37 = vector.shape_cast %34 : vector<1x512xf32> to vector<1x1x512xf32>
    tpu.vector_store %arg4[%c0_36, %c1_37, %c0_38], %37 {strides = array<i32>} : memref<1x2x512xf32, #tpu.memory_space<vmem>>, vector<1x1x512xf32>,
    return
  }
  func.func @transform_0(%arg0: i32) -> (i32, i32, i32) {
    %c0_i32 = arith.constant 0 : i32
    %c0_i32_0 = arith.constant 0 : i32
    %c0_i32_1 = arith.constant 0 : i32
    return %arg0, %c0_i32, %c0_i32_0 : i32, i32, i32
  }
  func.func @transform_1(%arg0: i32) -> (i32, i32, i32) {
    %c0_i32 = arith.constant 0 : i32
    %c0_i32_0 = arith.constant 0 : i32
    %c0_i32_1 = arith.constant 0 : i32
    %c0_i32_2 = arith.constant 0 : i32
    return %c0_i32, %c0_i32_0, %c0_i32_1 : i32, i32, i32
  }
  func.func @transform_2(%arg0: i32) -> (i32, i32) {
    %c0_i32 = arith.constant 0 : i32
    %c0_i32_0 = arith.constant 0 : i32
    return %arg0, %c0_i32 : i32, i32
  }
  func.func @transform_3(%arg0: i32) -> (i32, i32, i32) {
    %c0_i32 = arith.constant 0 : i32
    %c0_i32_0 = arith.constant 0 : i32
    %c0_i32_1 = arith.constant 0 : i32
    return %arg0, %c0_i32, %c0_i32_0 : i32, i32, i32
  }
}

module attributes {stable_mosaic.version = 11 : i64} {
  func.func @_bn_lrelu_kernel(%arg0: i32, %arg1: memref<16x512xbf16, #tpu.memory_space<vmem>>, %arg2: memref<1x512xf32, #tpu.memory_space<vmem>>, %arg3: memref<1x512xf32, #tpu.memory_space<vmem>>, %arg4: memref<16x512xf32, #tpu.memory_space<vmem>>) attributes {dimension_semantics = [#tpu.dimension_semantics<parallel>], iteration_bounds = array<i64: 2>, scalar_prefetch = 0 : i64, scratch_operands = 0 : i64, tpu.core_type = #tpu.core_type<tc>, window_params = [{transform_indices = @transform_0, window_bounds = array<i64: 16, 512>}, {pipeline_mode = #tpu.pipeline_mode<synchronous>, transform_indices = @transform_1, window_bounds = array<i64: 1, 512>}, {pipeline_mode = #tpu.pipeline_mode<synchronous>, transform_indices = @transform_2, window_bounds = array<i64: 1, 512>}, {transform_indices = @transform_3, window_bounds = array<i64: 16, 512>}]} {
    %c0 = arith.constant 0 : index
    %c0_0 = arith.constant 0 : index
    %0 = vector.load %arg1[%c0, %c0_0] : memref<16x512xbf16, #tpu.memory_space<vmem>>, vector<16x512xbf16>
    %1 = arith.extf %0 : vector<16x512xbf16> to vector<16x512xf32>
    %c0_1 = arith.constant 0 : index
    %c0_2 = arith.constant 0 : index
    %2 = vector.load %arg2[%c0_1, %c0_2] : memref<1x512xf32, #tpu.memory_space<vmem>>, vector<1x512xf32>
    %3 = vector.broadcast %2 : vector<1x512xf32> to vector<16x512xf32>
    %4 = arith.mulf %1, %3 : vector<16x512xf32>
    %c0_3 = arith.constant 0 : index
    %c0_4 = arith.constant 0 : index
    %5 = vector.load %arg3[%c0_3, %c0_4] : memref<1x512xf32, #tpu.memory_space<vmem>>, vector<1x512xf32>
    %6 = vector.broadcast %5 : vector<1x512xf32> to vector<16x512xf32>
    %7 = arith.addf %4, %6 : vector<16x512xf32>
    %cst = arith.constant 0.000000e+00 : f32
    %8 = vector.broadcast %cst : f32 to vector<16x512xf32>
    %9 = arith.cmpf oge, %7, %8 : vector<16x512xf32>
    %cst_5 = arith.constant 0.00999999977 : f32
    %10 = vector.broadcast %cst_5 : f32 to vector<16x512xf32>
    %11 = arith.mulf %10, %7 : vector<16x512xf32>
    %12 = arith.select %9, %7, %11 : vector<16x512xi1>, vector<16x512xf32>
    %c0_6 = arith.constant 0 : index
    %c0_7 = arith.constant 0 : index
    %13 = vector.load %arg4[%c0_6, %c0_7] : memref<16x512xf32, #tpu.memory_space<vmem>>, vector<16x512xf32>
    tpu.vector_store %arg4[%c0_6, %c0_7], %12 {strides = array<i32>} : memref<16x512xf32, #tpu.memory_space<vmem>>, vector<16x512xf32>,
    return
  }
  func.func @transform_0(%arg0: i32) -> (i32, i32) {
    %c0_i32 = arith.constant 0 : i32
    %c0_i32_0 = arith.constant 0 : i32
    return %arg0, %c0_i32 : i32, i32
  }
  func.func @transform_1(%arg0: i32) -> (i32, i32) {
    %c0_i32 = arith.constant 0 : i32
    %c0_i32_0 = arith.constant 0 : i32
    %c0_i32_1 = arith.constant 0 : i32
    return %c0_i32, %c0_i32_0 : i32, i32
  }
  func.func @transform_2(%arg0: i32) -> (i32, i32) {
    %c0_i32 = arith.constant 0 : i32
    %c0_i32_0 = arith.constant 0 : i32
    %c0_i32_1 = arith.constant 0 : i32
    return %c0_i32, %c0_i32_0 : i32, i32
  }
  func.func @transform_3(%arg0: i32) -> (i32, i32) {
    %c0_i32 = arith.constant 0 : i32
    %c0_i32_0 = arith.constant 0 : i32
    return %arg0, %c0_i32 : i32, i32
  }
}

</mosaic_0001>

<bundles_post_ra>
// kernel: tile.19
= control target key start
LH: loop header
LB: loop body
LE: loop exit
PB: predicated region body
PF: predicated region fallthrough
CT: control target
= control target key end

     0   :  { %s62_s8 = smov 96   ;;  %vm3_vm0 = vcmask 261120   ;;  %s64_s15 = smov 64   ;;  %vm9_vm1 = vcmask 1048320   ;;  %vm15_vm2 = vcmask 785920   ;;  %vm21_vm3 = vcmask 523520   ;;  %s99_s0 = inlined_call_operand.vmem [shape: f32[16,32], index: 0, kind: input, shape index: {}]   ;;  %s100_s1 = inlined_call_operand.vmem [shape: f32[1,512], index: 1, kind: output, shape index: {}]  }
   0x1   :  { %v53_v0 = vld [vmem:[%s99_s0 + $0x3] ss:$4 sm:$0xf]   ;;  %v54_v1 = vld [vmem:[%s99_s0 + $0x2] ss:$4 sm:$0xf]  }
   0x2   :  { %7 = vrot.lane.b32.xlu0 %v53_v0, %s62_s8  ;;  %v55_v2 = vld [vmem:[%s99_s0 + $0x1] ss:$4 sm:$0xf]   ;;  %v2_v3 = vld [vmem:[%s99_s0] ss:$4 sm:$0xf]  }
   0x3   :  { %s63_s0 = smov 32   ;;  %4 = vst.msk [vmem:[#allocation0] ss:$8 sm:$0xf] %vm3_vm0, %v2_v3  }
   0x4   :  { %19 = vrot.lane.b32.xlu1 %v55_v2, %s63_s0 }
   0x6   :  { %13 = vrot.lane.b32.xlu0 %v54_v1, %s64_s15 }
  0x74   :  { %v8_v4 = vpop.permute.xlu0 %7  }
  0x75   :  { %10 = vst.msk [vmem:[#allocation0] ss:$8 sm:$0xf] %vm9_vm1, %v8_v4  }
  0x76   :  { %v20_v5 = vpop.permute.xlu1 %19  }
  0x78   :  { %v14_v6 = vpop.permute.xlu0 %13  }
  0x79   :  { %16 = vst.msk [vmem:[#allocation0] ss:$8 sm:$0xf] %vm15_vm2, %v14_v6  }
  0x7a   :  { %22 = vst.msk [vmem:[#allocation0] ss:$8 sm:$0xf] %vm21_vm3, %v20_v5  }
  0x81   :  { %v27_v7 = vld [vmem:[#allocation0] sm:$0x1]  ;;  %v32_v8 = vld [vmem:[#allocation0 + $0x8] sm:$0x1]  ;;  %v38_v9 = vld [vmem:[#allocation0 + $0x10] sm:$0x1] }
  0x82   :  { %30 = vst [vmem:[%s100_s1] sm:$0x1] %v27_v7  ;;  %56 = vst [vmem:[%s100_s1 + $0x1] sm:$0x1] %v32_v8  ;;  %v45_v10 = vld [vmem:[#allocation0 + $0x18] sm:$0x1] }
  0x83   :  { %57 = vst [vmem:[%s100_s1 + $0x2] sm:$0x1] %v38_v9  ;;  %58 = vst [vmem:[%s100_s1 + $0x3] sm:$0x1] %v45_v10 }

// kernel: tile.18
= control target key start
LH: loop header
LB: loop body
LE: loop exit
PB: predicated region body
PF: predicated region fallthrough
CT: control target
= control target key end

     0   :  { %s28_s0 = inlined_call_operand.vmem [shape: f32[32], index: 0, kind: input, shape index: {}]   ;;  %s29_s1 = inlined_call_operand.vmem [shape: f32[16,32], index: 1, kind: output, shape index: {}]  }
   0x1   :  { %v4_v0 = vld [vmem:[%s28_s0] ss:$0 sm:$0xff] }
   0x2   :  { %5 = vst [vmem:[%s29_s1] sm:$0xff] %v4_v0  ;;  %8 = vst [vmem:[%s29_s1 + $0x8] sm:$0xff] %v4_v0 }

// kernel: load_kernel_network_forward.3
= control target key start
LH: loop header
LB: loop body
LE: loop exit
PB: predicated region body
PF: predicated region fallthrough
CT: control target
= control target key end

     0   :  { %s392_s12 = smov 0   ;;  %s429_s0 = inlined_call_operand.vmem [shape: bf16[32,512], index: 0, kind: input, shape index: {}]   ;;  %s430_s1 = inlined_call_operand.vmem [shape: f32[1,512], index: 1, kind: input, shape index: {}]   ;;  %s431_s2 = inlined_call_operand.vmem [shape: f32[1,512], index: 2, kind: input, shape index: {}]   ;;  %s432_s3 = inlined_call_operand.vmem [shape: f32[32,512], index: 3, kind: output, shape index: {}]  }
   0x1 LB: > { %s341_s13 = sadd.s32 4294967295, %s370_s12   ;;  %p345_p0 = scmp.ge.s32.totalorder %s370_s12, 1  ;;  %s370_s12 = sphi %s392_s12, %s13_s12  }
   0x2   : > { %p139_p1 = scmp.lt.s32.totalorder %s370_s12, 3 }
   0x4   : > { %p140_p2 = pnand %p345_p0, %p139_p1 }
   0x5   : > { %s346_s14 = sshll.u32 (!%p140_p2), %s341_s13, 1 }
   0x6   : > { %143 = sbr.rel (%p140_p2) target bundleno = 33 (0x21), region = 32  ;;  %p166_p3 = scmp.lt.s32.totalorder (!%p140_p2), %s346_s14, 3 }
   0xb   : > { %v193_v0 = vlaneseq  ;;  %s434_s14 = smov (!%p166_p3, %s346_s14), 3  ;;  %v191_v2 = vld [vmem:[%s430_s1] sm:$0xf] }
   0xc   : > { %v221_v3 = vld [vmem:[%s431_s2] sm:$0xf]  ;;  %s354_s19 = sshll.u32 %s434_s14, 4  ;;  %s355_s23 = sshll.u32 %s434_s14, 5 }
   0xd   : > { %v194_v1 = vshrl.u32 %v193_v0, 7  ;;  %s170_s22 = scalar_lea.vmem %s429_s0, %s354_s19  ;;  %s416_s26 = scalar_lea.vmem %s432_s3, %s355_s23 }
   0xe   : > { %v179_v12 = vld [vmem:[%s170_s22] sm:$0xff]  ;;  %v180_v13 = vld [vmem:[%s170_s22 + $0x8] sm:$0xff]  ;;  %v181_v18 = vld [vmem:[%s170_s22 + $0x10] sm:$0xff] }
   0xf   : > { %v195_v4 = vsub.s32 0, %v194_v1  ;;  %v199_v5 = vsub.s32 1, %v194_v1  ;;  %v203_v6 = vsub.s32 2, %v194_v1  ;;  %v207_v7 = vsub.s32 3, %v194_v1  ;;  %v182_v23 = vld [vmem:[%s170_s22 + $0x18] sm:$0xff] }
  0x10   : > { %v183_v19 = vunpack.c.l.bf16 %v179_v12  ;;  %v184_v20 = vunpack.c.h.bf16 %v179_v12  ;;  %v185_v21 = vunpack.c.l.bf16 %v180_v13  ;;  %v186_v22 = vunpack.c.h.bf16 %v180_v13 }
  0x11   : > { %v196_v8 = vrot.slane %v191_v2, %v195_v4  ;;  %v226_v9 = vrot.slane %v221_v3, %v195_v4  ;;  %v200_v10 = vrot.slane %v191_v2, %v199_v5  ;;  %v230_v11 = vrot.slane %v221_v3, %v199_v5 }
  0x12   : > { %v204_v14 = vrot.slane %v191_v2, %v203_v6  ;;  %v234_v15 = vrot.slane %v221_v3, %v203_v6  ;;  %v208_v16 = vrot.slane %v191_v2, %v207_v7  ;;  %v238_v17 = vrot.slane %v221_v3, %v207_v7 }
  0x13   : > { %v187_v24 = vunpack.c.l.bf16 %v181_v18  ;;  %v188_v25 = vunpack.c.h.bf16 %v181_v18  ;;  %v189_v26 = vunpack.c.l.bf16 %v182_v23  ;;  %v190_v27 = vunpack.c.h.bf16 %v182_v23 }
  0x14   : > { %v213_v28 = vmul.f32 %v196_v8, %v183_v19  ;;  %v214_v29 = vmul.f32 %v200_v10, %v184_v20  ;;  %v215_v30 = vmul.f32 %v204_v14, %v185_v21  ;;  %v216_v31 = vmul.f32 %v208_v16, %v186_v22 }
  0x15   : > { %v217_v32 = vmul.f32 %v196_v8, %v187_v24  ;;  %v218_v33 = vmul.f32 %v200_v10, %v188_v25  ;;  %v219_v34 = vmul.f32 %v204_v14, %v189_v26  ;;  %v220_v35 = vmul.f32 %v208_v16, %v190_v27 }
  0x16   : > { %v243_v36 = vadd.f32 %v226_v9, %v213_v28  ;;  %v244_v37 = vadd.f32 %v230_v11, %v214_v29  ;;  %v245_v38 = vadd.f32 %v234_v15, %v215_v30  ;;  %v246_v39 = vadd.f32 %v238_v17, %v216_v31 }
  0x17   : > { %v247_v40 = vadd.f32 %v226_v9, %v217_v32  ;;  %v248_v41 = vadd.f32 %v230_v11, %v218_v33  ;;  %v249_v42 = vadd.f32 %v234_v15, %v219_v34  ;;  %v250_v43 = vadd.f32 %v238_v17, %v220_v35 }
  0x18   : > { %vm251_vm0 = vcmp.ge.f32.partialorder %v243_v36, 0.0  ;;  %v259_v44 = vmul.f32 0.01, %v243_v36  ;;  %vm252_vm1 = vcmp.ge.f32.partialorder %v244_v37, 0.0  ;;  %v260_v45 = vmul.f32 0.01, %v244_v37 }
  0x19   : > { %vm253_vm2 = vcmp.ge.f32.partialorder %v245_v38, 0.0  ;;  %v261_v46 = vmul.f32 0.01, %v245_v38  ;;  %vm254_vm3 = vcmp.ge.f32.partialorder %v246_v39, 0.0  ;;  %v262_v47 = vmul.f32 0.01, %v246_v39 }
  0x1a   : > { %v267_v48 = vsel %vm251_vm0, %v243_v36, %v259_v44  ;;  %v268_v49 = vsel %vm252_vm1, %v244_v37, %v260_v45  ;;  %vm255_vm4 = vcmp.ge.f32.partialorder %v247_v40, 0.0  ;;  %v263_v50 = vmul.f32 0.01, %v247_v40 }
  0x1b   : > { %275 = vst [vmem:[%s416_s26] sm:$0xff] %v267_v48  ;;  %276 = vst [vmem:[%s416_s26 + $0x8] sm:$0xff] %v268_v49  ;;  %v269_v51 = vsel %vm253_vm2, %v245_v38, %v261_v46  ;;  %v270_v52 = vsel %vm254_vm3, %v246_v39, %v262_v47  ;;  %vm256_vm5 = vcmp.ge.f32.partialorder %v248_v41, 0.0  ;;  %v264_v53 = vmul.f32 0.01, %v248_v41 }
  0x1c   : > { %277 = vst [vmem:[%s416_s26 + $0x10] sm:$0xff] %v269_v51  ;;  %278 = vst [vmem:[%s416_s26 + $0x18] sm:$0xff] %v270_v52  ;;  %v271_v54 = vsel %vm255_vm4, %v247_v40, %v263_v50  ;;  %vm257_vm6 = vcmp.ge.f32.partialorder %v249_v42, 0.0  ;;  %v265_v55 = vmul.f32 0.01, %v249_v42  ;;  %vm258_vm7 = vcmp.ge.f32.partialorder %v250_v43, 0.0 }
  0x1d   : > { %279 = vst [vmem:[%s416_s26 + $0x20] sm:$0xff] %v271_v54  ;;  %v272_v56 = vsel %vm256_vm5, %v248_v41, %v264_v53  ;;  %v266_v57 = vmul.f32 0.01, %v250_v43 }
  0x1e   : > { %280 = vst [vmem:[%s416_s26 + $0x28] sm:$0xff] %v272_v56  ;;  %v273_v58 = vsel %vm257_vm6, %v249_v42, %v265_v55 }
  0x1f   : > { %281 = vst [vmem:[%s416_s26 + $0x30] sm:$0xff] %v273_v58  ;;  %v274_v59 = vsel %vm258_vm7, %v250_v43, %v266_v57 }
  0x20   : > { %282 = vst [vmem:[%s416_s26 + $0x38] sm:$0xff] %v274_v59 }
  0x21 PF: > { %s13_s12 = sadd.s32 1, %s370_s12  }
  0x22   : > { %p10_p4 = scmp.ge.s32.totalorder %s13_s12, 4  }
  0x24   :  { %12 = sbr.rel (!%p10_p4) target bundleno = 1 (0x1), region = 62 }

// kernel: load_kernel_network_forward.2
= control target key start
LH: loop header
LB: loop body
LE: loop exit
PB: predicated region body
PF: predicated region fallthrough
CT: control target
= control target key end

     0   :  { %9 = vsyncpa [#allocation4], 0  ;;  %s4493_s12 = smov 0   ;;  %s4721_s0 = inlined_call_operand.vmem [shape: f32[2,16,512], index: 0, kind: input, shape index: {}]   ;;  %s4722_s1 = inlined_call_operand.hbm [shape: bf16[3,512,512], index: 1, kind: input, shape index: {}]   ;;  %s4723_s2 = inlined_call_operand.vmem [shape: bf16[32,512], index: 2, kind: output, shape index: {0}]   ;;  %s4724_s3 = inlined_call_operand.vmem [shape: f32[2,2,512], index: 3, kind: output, shape index: {1}]  }
   0x1 LB: > { %s4499_s13 = sadd.s32 4294967295, %s4466_s12   ;;  %p3417_p0 = scmp.ge.s32.totalorder %s4466_s12, 1  ;;  %s4466_s12 = sphi %s4493_s12, %s15_s12  }
   0x2   : > { %p119_p1 = scmp.lt.s32.totalorder %s4466_s12, 3  ;;  %s4468_s14 = smov [#allocation3]  }
   0x3   : > { %s131_s15 = sshll.u32 %s4468_s14, 4  ;;  %p3835_p3 = scmp.eq.s32.totalorder %s4499_s13, 0  ;;  %s132_s15 = int_to_ptr.vmem [resolvable:$true] %s131_s15 }
   0x4   : > { %p4503_p2 = pnand %p3417_p0, %p119_p1  ;;  %s4441_s17 = scalar_lea.vmem %s132_s15, 49152 }
   0x5   : > { %p4442_p7 = scmp.ne.s32.totalorder %s132_s15, %s4441_s17  ;;  %p4449_p10 = scmp.lt.s32.totalorder %s132_s15, %s132_s15 }
   0x6   : > { %p3831_p4 = pneg %p4503_p2  ;;  %p4450_p11 = scmp.lt.s32.totalorder %s4441_s17, %s4441_s17 }
   0x8   : > { %p3832_p5 = pnand %p3835_p3, %p3831_p4  ;;  %p4451_p12 = por %p4450_p11, %p4449_p10 }
   0xa   : > { %p4432_p6 = pneg %p3832_p5 }
   0xc   : > { %p4444_p8 = pnand %p4442_p7, %p4432_p6 }
   0xe   : > { %p4445_p9 = pneg %p4444_p8 }
  0x10   : > { %p4452_p13 = pnand %p4451_p12, %p4445_p9 }
  0x12   : > { %4455 = shalt.err (!%p4452_p13)
}
  0x13   : > { %s4469_s18 = smov 256   ;;  %s4470_s19 = smov 16  }
  0x14   : > { %3834 = dma.hbm_to_vmem [thread:$0]  (!%p3832_p5), %s4722_s1, 49152, %s132_s15, [#allocation4], %s4469_s18, %s4469_s18, %s4470_s19  }
  0x15   : > { %155 = sbr.rel (%p4503_p2) target bundleno = 642 (0x282), region = 28 }
  0x1a   : > { %4461 = dma.done.wait (%p3835_p3), [#allocation4], 49152  }
  0x1b   : > { %4463 = vsyncadd (%p3835_p3), [#allocation4], 4294918144  ;;  %v3850_v0 = vld [vmem:[#allocation3 + $0x4e4] ss:$16 sps:$4 sm:$0xff]   ;;  %v3854_v2 = vld [vmem:[#allocation3 + $0x4e0] ss:$16 sps:$4 sm:$0xff]  }
  0x1c   : > { %v3852_v1 = vld [vmem:[#allocation3 + $0x6e4] ss:$16 sps:$4 sm:$0xff]   ;;  %1201 = vmatprep.subr.bf16.mxu0 %v3850_v0  ;;  %v3855_v3 = vld [vmem:[#allocation3 + $0x6e0] ss:$16 sps:$4 sm:$0xff]   ;;  %p185_p0 = scmp.lt.s32.totalorder %s4499_s13, 1  ;;  %v202_v0 = vlaneseq  ;;  %vm227_vm1 = vcmask 1040384  }
  0x1d   : > { %1244 = vmatprep.subr.bf16.mxu1 %v3852_v1  ;;  %v3856_v4 = vld [vmem:[#allocation3 + $0x4c4] ss:$16 sps:$4 sm:$0xff]   ;;  %1202 = vmatpush1.bf16.msra.mxu0 %v3854_v2  ;;  %v3860_v6 = vld [vmem:[#allocation3 + $0x4c0] ss:$16 sps:$4 sm:$0xff]   ;;  %vm2322_vm2 = vcmask 1046528   ;;  %s3424_s27 = sshll.u32 %s4499_s13, 1 }
  0x1e   : > { %1245 = vmatpush1.bf16.msra.mxu1 %v3855_v3  ;;  %v3858_v5 = vld [vmem:[#allocation3 + $0x6c4] ss:$16 sps:$4 sm:$0xff]   ;;  %1203 = vmatprep.subr.bf16.mxu0 %v3856_v4  ;;  %v3861_v7 = vld [vmem:[#allocation3 + $0x6c0] ss:$16 sps:$4 sm:$0xff]   ;;  %s4523_s22 = scalar_select %p185_p0, %s4499_s13, 1  ;;  %vm4556_vm0 = vcmp.lt.s32.totalorder %v202_v0, 512 }
  0x1f   : > { %1246 = vmatprep.subr.bf16.mxu1 %v3858_v5  ;;  %v3862_v8 = vld [vmem:[#allocation3 + $0x4a4] ss:$16 sps:$4 sm:$0xff]   ;;  %v3866_v10 = vld [vmem:[#allocation3 + $0x4a0] ss:$16 sps:$4 sm:$0xff]   ;;  %p191_p1 = scmp.lt.s32.totalorder %s3424_s27, 3 }
  0x20   : > { %v3864_v9 = vld [vmem:[#allocation3 + $0x6a4] ss:$16 sps:$4 sm:$0xff]   ;;  %v3867_v11 = vld [vmem:[#allocation3 + $0x6a0] ss:$16 sps:$4 sm:$0xff]   ;;  %s3820_s23 = sshll.u32 %s4523_s22, 6  ;;  %s3822_s5 = sshll.u32 %s4523_s22, 3 }
  0x21   : > { %1204 = vmatpush1.bf16.msra.mxu0 %v3860_v6  ;;  %v3868_v12 = vld [vmem:[#allocation3 + $0x484] ss:$16 sps:$4 sm:$0xff]   ;;  %v3872_v14 = vld [vmem:[#allocation3 + $0x480] ss:$16 sps:$4 sm:$0xff]   ;;  %s4529_s26 = scalar_lea.vmem %s4721_s0, %s3820_s23  ;;  %s4729_s27 = smov (!%p191_p1, %s3424_s27), 3 }
  0x22   : > { %1247 = vmatpush1.bf16.msra.mxu1 %v3861_v7  ;;  %1205 = vmatprep.subr.bf16.mxu0 %v3862_v8  ;;  %v3870_v13 = vld [vmem:[#allocation3 + $0x684] ss:$16 sps:$4 sm:$0xff]   ;;  %v3873_v15 = vld [vmem:[#allocation3 + $0x680] ss:$16 sps:$4 sm:$0xff]   ;;  %v4532_v46 = vld [vmem:[%s4529_s26 + $0x8] sm:$0xff]  ;;  %s3821_s28 = sshll.u32 %s4729_s27, 4  ;;  %s201_s8 = scalar_lea.vmem %s4724_s3, %s3822_s5 }
  0x23   : > { %1248 = vmatprep.subr.bf16.mxu1 %v3864_v9  ;;  %v3874_v16 = vld [vmem:[#allocation3 + $0x464] ss:$16 sps:$4 sm:$0xff]   ;;  %v3878_v18 = vld [vmem:[#allocation3 + $0x460] ss:$16 sps:$4 sm:$0xff]   ;;  %v4535_v47 = vld [vmem:[%s4529_s26 + $0x28] sm:$0xff]  ;;  %v229_v3 = vrot.slane %v4532_v46, 7  ;;  %s4684_s4 = scalar_lea.vmem %s4723_s2, %s3821_s28 }
  0x24   : > { %v3876_v17 = vld [vmem:[#allocation3 + $0x664] ss:$16 sps:$4 sm:$0xff]   ;;  %v3879_v19 = vld [vmem:[#allocation3 + $0x660] ss:$16 sps:$4 sm:$0xff]   ;;  %v4538_v48 = vld [vmem:[%s4529_s26 + $0x18] sm:$0xff]  ;;  %v4545_v53 = vpack.c.bf16 %v4535_v47, %v4532_v46 }
  0x25   : > { %1206 = vmatpush1.bf16.msra.mxu0 %v3866_v10  ;;  %v3880_v20 = vld [vmem:[#allocation3 + $0x444] ss:$16 sps:$4 sm:$0xff]   ;;  %v3884_v22 = vld [vmem:[#allocation3 + $0x440] ss:$16 sps:$4 sm:$0xff]   ;;  %v4541_v49 = vld [vmem:[%s4529_s26 + $0x38] sm:$0xff]  ;;  %v231_v8 = vrot.slane %v4538_v48, 7 }
  0x26   : > { %1249 = vmatpush1.bf16.msra.mxu1 %v3867_v11  ;;  %1207 = vmatprep.subr.bf16.mxu0 %v3868_v12  ;;  %v3882_v21 = vld [vmem:[#allocation3 + $0x644] ss:$16 sps:$4 sm:$0xff]   ;;  %v3885_v23 = vld [vmem:[#allocation3 + $0x640] ss:$16 sps:$4 sm:$0xff]   ;;  %v4549_v54 = vpack.c.bf16 %v4541_v49, %v4538_v48  ;;  %253 = vst [vmem:[#allocation2 + $0x8] sm:$0xfe] %v229_v3 }
  0x27   : > { %1250 = vmatprep.subr.bf16.mxu1 %v3870_v13  ;;  %v3886_v24 = vld [vmem:[#allocation3 + $0x424] ss:$16 sps:$4 sm:$0xff]   ;;  %v3890_v26 = vld [vmem:[#allocation3 + $0x420] ss:$16 sps:$4 sm:$0xff]   ;;  %1233 = vmatprep.mubr.bf16.mxu0 %v4545_v53  ;;  %v4471_v10 = vmov 0.0  }
  0x28   : > { %v3888_v25 = vld [vmem:[#allocation3 + $0x624] ss:$16 sps:$4 sm:$0xff]   ;;  %v3891_v27 = vld [vmem:[#allocation3 + $0x620] ss:$16 sps:$4 sm:$0xff]   ;;  %1276 = vmatprep.mubr.bf16.mxu1 %v4549_v54  ;;  %255 = vst [vmem:[#allocation2 + $0x18] sm:$0xfe] %v231_v8 }
  0x29   : > { %1208 = vmatpush1.bf16.msra.mxu0 %v3872_v14  ;;  %v3892_v28 = vld [vmem:[#allocation3 + $0x404] ss:$16 sps:$4 sm:$0xff]   ;;  %v3896_v30 = vld [vmem:[#allocation3 + $0x400] ss:$16 sps:$4 sm:$0xff]   ;;  %v3973_v46 = vld [vmem:[#allocation3 + $0x668] ss:$16 sps:$4 sm:$0xff]  }
  0x2a   : > { %1251 = vmatpush1.bf16.msra.mxu1 %v3873_v15  ;;  %1209 = vmatprep.subr.bf16.mxu0 %v3874_v16  ;;  %v3894_v29 = vld [vmem:[#allocation3 + $0x604] ss:$16 sps:$4 sm:$0xff]   ;;  %v3897_v31 = vld [vmem:[#allocation3 + $0x600] ss:$16 sps:$4 sm:$0xff]   ;;  %v3981_v48 = vld [vmem:[#allocation3 + $0x64c] ss:$16 sps:$4 sm:$0xff]  }
  0x2b   : > { %1252 = vmatprep.subr.bf16.mxu1 %v3876_v17  ;;  %v3898_v32 = vld [vmem:[#allocation3 + $0x5e4] ss:$16 sps:$4 sm:$0xff]   ;;  %v3902_v34 = vld [vmem:[#allocation3 + $0x5e0] ss:$16 sps:$4 sm:$0xff]   ;;  %v3948_v17 = vld [vmem:[#allocation3 + $0x4ec] ss:$16 sps:$4 sm:$0xff]  }
  0x2c   : > { %v3900_v33 = vld [vmem:[#allocation3 + $0x7e4] ss:$16 sps:$4 sm:$0xff]   ;;  %v3903_v35 = vld [vmem:[#allocation3 + $0x7e0] ss:$16 sps:$4 sm:$0xff]  }
  0x2d   : > { %1210 = vmatpush1.bf16.msra.mxu0 %v3878_v18  ;;  %v3904_v36 = vld [vmem:[#allocation3 + $0x5c4] ss:$16 sps:$4 sm:$0xff]   ;;  %v3908_v38 = vld [vmem:[#allocation3 + $0x5c0] ss:$16 sps:$4 sm:$0xff]   ;;  %v3951_v18 = vld [vmem:[#allocation3 + $0x6ec] ss:$16 sps:$4 sm:$0xff]  }
  0x2e   : > { %1253 = vmatpush1.bf16.msra.mxu1 %v3879_v19  ;;  %1211 = vmatprep.subr.bf16.mxu0 %v3880_v20  ;;  %v3906_v37 = vld [vmem:[#allocation3 + $0x7c4] ss:$16 sps:$4 sm:$0xff]   ;;  %v3909_v39 = vld [vmem:[#allocation3 + $0x7c0] ss:$16 sps:$4 sm:$0xff]   ;;  %v234_v19 = vrot.slane %v4535_v47, 7  ;;  %v238_v20 = vrot.slane %v4541_v49, 7 }
  0x2f   : > { %1254 = vmatprep.subr.bf16.mxu1 %v3882_v21  ;;  %v3910_v40 = vld [vmem:[#allocation3 + $0x5a4] ss:$16 sps:$4 sm:$0xff]   ;;  %v3914_v42 = vld [vmem:[#allocation3 + $0x5a0] ss:$16 sps:$4 sm:$0xff]   ;;  %v3978_v47 = vld [vmem:[#allocation3 + $0x44c] ss:$16 sps:$4 sm:$0xff]  }
  0x30   : > { %v3912_v41 = vld [vmem:[#allocation3 + $0x7a4] ss:$16 sps:$4 sm:$0xff]   ;;  %v3915_v43 = vld [vmem:[#allocation3 + $0x7a0] ss:$16 sps:$4 sm:$0xff]   ;;  %261 = vst [vmem:[#allocation2 + $0x48] sm:$0x1] %v234_v19 }
  0x31   : > { %1212 = vmatpush1.bf16.msra.mxu0 %v3884_v22  ;;  %v3916_v44 = vld [vmem:[#allocation3 + $0x584] ss:$16 sps:$4 sm:$0xff]   ;;  %v3920_v50 = vld [vmem:[#allocation3 + $0x580] ss:$16 sps:$4 sm:$0xff]   ;;  %263 = vst [vmem:[#allocation2 + $0x58] sm:$0x1] %v238_v20 }
  0x32   : > { %1255 = vmatpush1.bf16.msra.mxu1 %v3885_v23  ;;  %1213 = vmatprep.subr.bf16.mxu0 %v3886_v24  ;;  %v3918_v45 = vld [vmem:[#allocation3 + $0x784] ss:$16 sps:$4 sm:$0xff]   ;;  %v3921_v51 = vld [vmem:[#allocation3 + $0x780] ss:$16 sps:$4 sm:$0xff]   ;;  %v3946_v23 = vld [vmem:[#allocation3 + $0x4e8] ss:$16 sps:$4 sm:$0xff]  }
  0x33   : > { %1256 = vmatprep.subr.bf16.mxu1 %v3888_v25  ;;  %v3922_v52 = vld [vmem:[#allocation3 + $0x564] ss:$16 sps:$4 sm:$0xff]   ;;  %v3926_v56 = vld [vmem:[#allocation3 + $0x560] ss:$16 sps:$4 sm:$0xff]   ;;  %v3949_v24 = vld [vmem:[#allocation3 + $0x6e8] ss:$16 sps:$4 sm:$0xff]   ;;  %v4575_v25 = vsel %vm227_vm1, %v229_v3, %v234_v19 }
  0x34   : > { %v3924_v55 = vld [vmem:[#allocation3 + $0x764] ss:$16 sps:$4 sm:$0xff]   ;;  %v3927_v57 = vld [vmem:[#allocation3 + $0x760] ss:$16 sps:$4 sm:$0xff]   ;;  %257 = vst [vmem:[#allocation2 + $0x28] sm:$0xff] %v4575_v25 }
  0x35   : > { %1214 = vmatpush1.bf16.msra.mxu0 %v3890_v26  ;;  %v3928_v58 = vld [vmem:[#allocation3 + $0x544] ss:$16 sps:$4 sm:$0xff]   ;;  %v3932_v60 = vld [vmem:[#allocation3 + $0x540] ss:$16 sps:$4 sm:$0xff]   ;;  %v4578_v26 = vsel %vm227_vm1, %v231_v8, %v238_v20  ;;  %v3976_v49 = vld [vmem:[#allocation3 + $0x448] ss:$16 sps:$4 sm:$0xff]  }
  0x36   : > { %1257 = vmatpush1.bf16.msra.mxu1 %v3891_v27  ;;  %1215 = vmatprep.subr.bf16.mxu0 %v3892_v28  ;;  %v3930_v59 = vld [vmem:[#allocation3 + $0x744] ss:$16 sps:$4 sm:$0xff]   ;;  %v3933_v61 = vld [vmem:[#allocation3 + $0x740] ss:$16 sps:$4 sm:$0xff]   ;;  %v3954_v28 = vld [vmem:[#allocation3 + $0x4cc] ss:$16 sps:$4 sm:$0xff]  }
  0x37   : > { %1258 = vmatprep.subr.bf16.mxu1 %v3894_v29  ;;  %v3934_v62 = vld [vmem:[#allocation3 + $0x524] ss:$16 sps:$4 sm:$0xff]   ;;  %v3938_v1 = vld [vmem:[#allocation3 + $0x520] ss:$16 sps:$4 sm:$0xff]   ;;  %259 = vst [vmem:[#allocation2 + $0x38] sm:$0xff] %v4578_v26 }
  0x38   : > { %v3936_v63 = vld [vmem:[#allocation3 + $0x724] ss:$16 sps:$4 sm:$0xff]   ;;  %v3939_v2 = vld [vmem:[#allocation3 + $0x720] ss:$16 sps:$4 sm:$0xff]   ;;  %v4003_v3 = vld [vmem:[#allocation3 + $0x7c8] ss:$16 sps:$4 sm:$0xff]  }
  0x39   : > { %1216 = vmatpush1.bf16.msra.mxu0 %v3896_v30  ;;  %v3940_v4 = vld [vmem:[#allocation3 + $0x504] ss:$16 sps:$4 sm:$0xff]   ;;  %206 = vst.msk [vmem:[#allocation2] ss:$8 sm:$0xf] %vm4556_vm0, %v4471_v10 }
  0x3a   : > { %1259 = vmatpush1.bf16.msra.mxu1 %v3897_v31  ;;  %1217 = vmatprep.subr.bf16.mxu0 %v3898_v32  ;;  %v276_v5 = vld [vmem:[%s4529_s26] sm:$0xff]  ;;  %v278_v7 = vld [vmem:[%s4529_s26 + $0x10] sm:$0xff]  ;;  %209 = vst.msk [vmem:[#allocation2 + $0x41] ss:$8 sm:$0xf] %vm4556_vm0, %v4471_v10 }
  0x3b   : > { %1260 = vmatprep.subr.bf16.mxu1 %v3900_v33  ;;  %v3942_v9 = vld [vmem:[#allocation3 + $0x704] ss:$16 sps:$4 sm:$0xff]   ;;  %v228_v11 = vrot.slane %v276_v5, 7  ;;  %v230_v12 = vrot.slane %v278_v7, 7  ;;  %v3944_v13 = vld [vmem:[#allocation3 + $0x500] ss:$16 sps:$4 sm:$0xff]  }
  0x3c   : > { %v3945_v14 = vld [vmem:[#allocation3 + $0x700] ss:$16 sps:$4 sm:$0xff]   ;;  %v3957_v30 = vld [vmem:[#allocation3 + $0x6cc] ss:$16 sps:$4 sm:$0xff]   ;;  %v3952_v33 = vld [vmem:[#allocation3 + $0x4c8] ss:$16 sps:$4 sm:$0xff]  }
  0x3d   : > { %1218 = vmatpush2.bf16.msra.mxu0 %v3902_v34  ;;  %v280_v15 = vld [vmem:[%s4529_s26 + $0x20] sm:$0xff]  ;;  %v282_v16 = vld [vmem:[%s4529_s26 + $0x30] sm:$0xff]  ;;  %252 = vst [vmem:[#allocation2] sm:$0xfe] %v228_v11  ;;  %254 = vst [vmem:[#allocation2 + $0x10] sm:$0xfe] %v230_v12 }
  0x3e   : > { %1261 = vmatpush2.bf16.msra.mxu1 %v3903_v35  ;;  %1219 = vmatprep.subr.bf16.mxu0 %v3904_v36  ;;  %v4570_v21 = vpack.c.bf16 %v280_v15, %v276_v5  ;;  %v4572_v22 = vpack.c.bf16 %v282_v16, %v278_v7  ;;  %v232_v27 = vrot.slane %v280_v15, 7  ;;  %v236_v29 = vrot.slane %v282_v16, 7  ;;  %v3955_v34 = vld [vmem:[#allocation3 + $0x6c8] ss:$16 sps:$4 sm:$0xff]   ;;  %v3960_v35 = vld [vmem:[#allocation3 + $0x4ac] ss:$16 sps:$4 sm:$0xff]  }
  0x3f   : > { %1262 = vmatprep.subr.bf16.mxu1 %v3906_v37  ;;  %v3963_v36 = vld [vmem:[#allocation3 + $0x6ac] ss:$16 sps:$4 sm:$0xff]   ;;  %v3958_v37 = vld [vmem:[#allocation3 + $0x4a8] ss:$16 sps:$4 sm:$0xff]  }
  0x40   : > { %v4583_v31 = vsel %vm227_vm1, %v228_v11, %v232_v27  ;;  %260 = vst [vmem:[#allocation2 + $0x40] sm:$0x1] %v232_v27  ;;  %v4587_v32 = vsel %vm227_vm1, %v230_v12, %v236_v29  ;;  %262 = vst [vmem:[#allocation2 + $0x50] sm:$0x1] %v236_v29  ;;  %v4011_v5 = vld [vmem:[#allocation3 + $0x7ac] ss:$16 sps:$4 sm:$0xff]  }
  0x41   : > { %1220 = vmatpush2.bf16.msra.mxu0 %v3908_v38  ;;  %256 = vst [vmem:[#allocation2 + $0x20] sm:$0xff] %v4583_v31  ;;  %258 = vst [vmem:[#allocation2 + $0x30] sm:$0xff] %v4587_v32  ;;  %v3961_v38 = vld [vmem:[#allocation3 + $0x6a8] ss:$16 sps:$4 sm:$0xff]   ;;  %v4017_v10 = vld [vmem:[#allocation3 + $0x78c] ss:$16 sps:$4 sm:$0xff]  }
  0x42   : > { %1263 = vmatpush2.bf16.msra.mxu1 %v3909_v39  ;;  %1221 = vmatprep.subr.bf16.mxu0 %v3910_v40  ;;  %v3966_v39 = vld [vmem:[#allocation3 + $0x48c] ss:$16 sps:$4 sm:$0xff]   ;;  %v4006_v7 = vld [vmem:[#allocation3 + $0x5a8] ss:$16 sps:$4 sm:$0xff]  }
  0x43   : > { %1264 = vmatprep.subr.bf16.mxu1 %v3912_v41  ;;  %v3969_v40 = vld [vmem:[#allocation3 + $0x68c] ss:$16 sps:$4 sm:$0xff]   ;;  %v3964_v41 = vld [vmem:[#allocation3 + $0x488] ss:$16 sps:$4 sm:$0xff]  }
  0x44   : > { %v4009_v8 = vld [vmem:[#allocation3 + $0x7a8] ss:$16 sps:$4 sm:$0xff]   ;;  %v4038_v29 = vld [vmem:[#allocation3 + $0x50c] ss:$16 sps:$4 sm:$0xff]  }
  0x45   : > { %1222 = vmatpush2.bf16.msra.mxu0 %v3914_v42  ;;  %v3967_v42 = vld [vmem:[#allocation3 + $0x688] ss:$16 sps:$4 sm:$0xff]  }
  0x46   : > { %1265 = vmatpush2.bf16.msra.mxu1 %v3915_v43  ;;  %1223 = vmatprep.subr.bf16.mxu0 %v3916_v44  ;;  %v3972_v43 = vld [vmem:[#allocation3 + $0x46c] ss:$16 sps:$4 sm:$0xff]   ;;  %v4012_v11 = vld [vmem:[#allocation3 + $0x588] ss:$16 sps:$4 sm:$0xff]  }
  0x47   : > { %1266 = vmatprep.subr.bf16.mxu1 %v3918_v45  ;;  %v3975_v44 = vld [vmem:[#allocation3 + $0x66c] ss:$16 sps:$4 sm:$0xff]   ;;  %v3970_v45 = vld [vmem:[#allocation3 + $0x468] ss:$16 sps:$4 sm:$0xff]  }
  0x48   : > { %v4015_v12 = vld [vmem:[#allocation3 + $0x788] ss:$16 sps:$4 sm:$0xff]  }
  0x49   : > { %1224 = vmatpush2.bf16.msra.mxu0 %v3920_v50  ;;  %v3979_v50 = vld [vmem:[#allocation3 + $0x648] ss:$16 sps:$4 sm:$0xff]  }
  0x4a   : > { %1267 = vmatpush2.bf16.msra.mxu1 %v3921_v51  ;;  %1225 = vmatprep.subr.bf16.mxu0 %v3922_v52  ;;  %v3984_v51 = vld [vmem:[#allocation3 + $0x42c] ss:$16 sps:$4 sm:$0xff]   ;;  %v4018_v15 = vld [vmem:[#allocation3 + $0x568] ss:$16 sps:$4 sm:$0xff]  }
  0x4b   : > { %1268 = vmatprep.subr.bf16.mxu1 %v3924_v55  ;;  %v3987_v52 = vld [vmem:[#allocation3 + $0x62c] ss:$16 sps:$4 sm:$0xff]   ;;  %v4021_v16 = vld [vmem:[#allocation3 + $0x768] ss:$16 sps:$4 sm:$0xff]  }
  0x4c   : > { %v3990_v55 = vld [vmem:[#allocation3 + $0x40c] ss:$16 sps:$4 sm:$0xff]   ;;  %v4024_v19 = vld [vmem:[#allocation3 + $0x548] ss:$16 sps:$4 sm:$0xff]  }
  0x4d   : > { %1226 = vmatpush2.bf16.msra.mxu0 %v3926_v56  ;;  %v3993_v56 = vld [vmem:[#allocation3 + $0x60c] ss:$16 sps:$4 sm:$0xff]   ;;  %v4027_v20 = vld [vmem:[#allocation3 + $0x748] ss:$16 sps:$4 sm:$0xff]  }
  0x4e   : > { %1269 = vmatpush2.bf16.msra.mxu1 %v3927_v57  ;;  %1227 = vmatprep.subr.bf16.mxu0 %v3928_v58  ;;  %v3988_v57 = vld [vmem:[#allocation3 + $0x408] ss:$16 sps:$4 sm:$0xff]  }
  0x4f   : > { %1270 = vmatprep.subr.bf16.mxu1 %v3930_v59  ;;  %v3991_v58 = vld [vmem:[#allocation3 + $0x608] ss:$16 sps:$4 sm:$0xff]   ;;  %v3996_v59 = vld [vmem:[#allocation3 + $0x5ec] ss:$16 sps:$4 sm:$0xff]  }
  0x50   : > { %v4030_v27 = vld [vmem:[#allocation3 + $0x528] ss:$16 sps:$4 sm:$0xff]  }
  0x51   : > { %1228 = vmatpush2.bf16.msra.mxu0 %v3932_v60  ;;  %v3999_v60 = vld [vmem:[#allocation3 + $0x7ec] ss:$16 sps:$4 sm:$0xff]  }
  0x52   : > { %1271 = vmatpush2.bf16.msra.mxu1 %v3933_v61  ;;  %1229 = vmatprep.subr.bf16.mxu0 %v3934_v62  ;;  %v3994_v61 = vld [vmem:[#allocation3 + $0x5e8] ss:$16 sps:$4 sm:$0xff]  }
  0x53   : > { %1272 = vmatprep.subr.bf16.mxu1 %v3936_v63  ;;  %v3997_v62 = vld [vmem:[#allocation3 + $0x7e8] ss:$16 sps:$4 sm:$0xff]   ;;  %v4002_v63 = vld [vmem:[#allocation3 + $0x5cc] ss:$16 sps:$4 sm:$0xff]  }
  0x55   : > { %1230 = vmatpush2.bf16.msra.mxu0 %v3938_v1  ;;  %v4005_v1 = vld [vmem:[#allocation3 + $0x7cc] ss:$16 sps:$4 sm:$0xff]  }
  0x56   : > { %1273 = vmatpush2.bf16.msra.mxu1 %v3939_v2  ;;  %1231 = vmatprep.subr.bf16.mxu0 %v3940_v4  ;;  %v4000_v2 = vld [vmem:[#allocation3 + $0x5c8] ss:$16 sps:$4 sm:$0xff]   ;;  %v4008_v4 = vld [vmem:[#allocation3 + $0x5ac] ss:$16 sps:$4 sm:$0xff]  }
  0x57   : > { %1274 = vmatprep.subr.bf16.mxu1 %v3942_v9  ;;  %v4014_v9 = vld [vmem:[#allocation3 + $0x58c] ss:$16 sps:$4 sm:$0xff]  }
  0x59   : > { %1232 = vmatpush2.bf16.msra.mxu0 %v3944_v13  ;;  %v4020_v13 = vld [vmem:[#allocation3 + $0x56c] ss:$16 sps:$4 sm:$0xff]  }
  0x5a   : > { %1275 = vmatpush2.bf16.msra.mxu1 %v3945_v14  ;;  %1287 = vmatprep.subr.bf16.mxu0 %v3948_v17  ;;  %v4023_v14 = vld [vmem:[#allocation3 + $0x76c] ss:$16 sps:$4 sm:$0xff]  }
  0x5b   : > { %1330 = vmatprep.subr.bf16.mxu1 %v3951_v18  ;;  %v4026_v17 = vld [vmem:[#allocation3 + $0x54c] ss:$16 sps:$4 sm:$0xff]  }
  0x5c   : > { %1234 = vmatmul.mubr.bf16.vlgmr.msra.gmra.mxu0 %v4570_v21  ;;  %v4029_v18 = vld [vmem:[#allocation3 + $0x74c] ss:$16 sps:$4 sm:$0xff]  }
  0x5d   : > { %1277 = vmatmul.mubr.bf16.vlgmr.msra.gmra.mxu1 %v4572_v22  ;;  %1288 = vmatpush1.bf16.msra.mxu0 %v3946_v23  ;;  %v4032_v23 = vld [vmem:[#allocation3 + $0x52c] ss:$16 sps:$4 sm:$0xff]  }
  0x5e   : > { %1331 = vmatpush1.bf16.msra.mxu1 %v3949_v24  ;;  %1289 = vmatprep.subr.bf16.mxu0 %v3954_v28  ;;  %v4035_v24 = vld [vmem:[#allocation3 + $0x72c] ss:$16 sps:$4 sm:$0xff]   ;;  %v4033_v28 = vld [vmem:[#allocation3 + $0x728] ss:$16 sps:$4 sm:$0xff]  }
  0x5f   : > { %1332 = vmatprep.subr.bf16.mxu1 %v3957_v30  ;;  %1319 = vmatprep.mubr.bf16.mxu0 %v4545_v53  ;;  %v3982_v53 = vld [vmem:[#allocation3 + $0x428] ss:$16 sps:$4 sm:$0xff]   ;;  %v4041_v30 = vld [vmem:[#allocation3 + $0x70c] ss:$16 sps:$4 sm:$0xff]  }
  0x60   : > { %1362 = vmatprep.mubr.bf16.mxu1 %v4549_v54  ;;  %v3985_v54 = vld [vmem:[#allocation3 + $0x628] ss:$16 sps:$4 sm:$0xff]  }
  0x61   : > { %1290 = vmatpush1.bf16.msra.mxu0 %v3952_v33  ;;  %v4036_v33 = vld [vmem:[#allocation3 + $0x508] ss:$16 sps:$4 sm:$0xff]  }
  0x62   : > { %1333 = vmatpush1.bf16.msra.mxu1 %v3955_v34  ;;  %1291 = vmatprep.subr.bf16.mxu0 %v3960_v35  ;;  %v4039_v34 = vld [vmem:[#allocation3 + $0x708] ss:$16 sps:$4 sm:$0xff]   ;;  %v4044_v35 = vld [vmem:[#allocation3 + $0xe4] ss:$16 sps:$4 sm:$0xff]  }
  0x63   : > { %1334 = vmatprep.subr.bf16.mxu1 %v3963_v36  ;;  %v4047_v36 = vld [vmem:[#allocation3 + $0x2e4] ss:$16 sps:$4 sm:$0xff]  }
  0x65   : > { %1292 = vmatpush1.bf16.msra.mxu0 %v3958_v37  ;;  %v4042_v37 = vld [vmem:[#allocation3 + $0xe0] ss:$16 sps:$4 sm:$0xff]  }
  0x66   : > { %1335 = vmatpush1.bf16.msra.mxu1 %v3961_v38  ;;  %1293 = vmatprep.subr.bf16.mxu0 %v3966_v39  ;;  %v4045_v38 = vld [vmem:[#allocation3 + $0x2e0] ss:$16 sps:$4 sm:$0xff]   ;;  %v4050_v39 = vld [vmem:[#allocation3 + $0xc4] ss:$16 sps:$4 sm:$0xff]  }
  0x67   : > { %1336 = vmatprep.subr.bf16.mxu1 %v3969_v40  ;;  %v4053_v40 = vld [vmem:[#allocation3 + $0x2c4] ss:$16 sps:$4 sm:$0xff]  }
  0x69   : > { %1294 = vmatpush1.bf16.msra.mxu0 %v3964_v41  ;;  %v265_v41 = vld [vmem:[#allocation2 + $0x8] sm:$0xff] }
  0x6a   : > { %1337 = vmatpush1.bf16.msra.mxu1 %v3967_v42  ;;  %1295 = vmatprep.subr.bf16.mxu0 %v3972_v43  ;;  %v4597_v42 = vpack.c.bf16 %v4575_v25, %v265_v41  ;;  %v267_v43 = vld [vmem:[#allocation2 + $0x18] sm:$0xff]  ;;  %v4062_v25 = vld [vmem:[#allocation3 + $0x84] ss:$16 sps:$4 sm:$0xff]   ;;  %v4132_v41 = vld [vmem:[#allocation3 + $0x100] ss:$16 sps:$4 sm:$0xff]  }
  0x6b   : > { %1338 = vmatprep.subr.bf16.mxu1 %v3975_v44  ;;  %v4048_v44 = vld [vmem:[#allocation3 + $0xc0] ss:$16 sps:$4 sm:$0xff]  }
  0x6d   : > { %1296 = vmatpush1.bf16.msra.mxu0 %v3970_v45  ;;  %v4051_v45 = vld [vmem:[#allocation3 + $0x2c0] ss:$16 sps:$4 sm:$0xff]  }
  0x6e   : > { %1339 = vmatpush1.bf16.msra.mxu1 %v3973_v46  ;;  %1297 = vmatprep.subr.bf16.mxu0 %v3978_v47  ;;  %v4600_v46 = vpack.c.bf16 %v4578_v26, %v267_v43  ;;  %v4056_v47 = vld [vmem:[#allocation3 + $0xa4] ss:$16 sps:$4 sm:$0xff]   ;;  %v4060_v26 = vld [vmem:[#allocation3 + $0x80] ss:$16 sps:$4 sm:$0xff]  }
  0x6f   : > { %1340 = vmatprep.subr.bf16.mxu1 %v3981_v48  ;;  %v4059_v48 = vld [vmem:[#allocation3 + $0x2a4] ss:$16 sps:$4 sm:$0xff]   ;;  %v4135_v43 = vld [vmem:[#allocation3 + $0x300] ss:$16 sps:$4 sm:$0xff]  }
  0x71   : > { %1298 = vmatpush1.bf16.msra.mxu0 %v3976_v49  ;;  %v4065_v49 = vld [vmem:[#allocation3 + $0x284] ss:$16 sps:$4 sm:$0xff]  }
  0x72   : > { %1341 = vmatpush1.bf16.msra.mxu1 %v3979_v50  ;;  %1299 = vmatprep.subr.bf16.mxu0 %v3984_v51  ;;  %v4063_v50 = vld [vmem:[#allocation3 + $0x280] ss:$16 sps:$4 sm:$0xff]   ;;  %v4068_v51 = vld [vmem:[#allocation3 + $0x64] ss:$16 sps:$4 sm:$0xff]  }
  0x73   : > { %1342 = vmatprep.subr.bf16.mxu1 %v3987_v52  ;;  %v4071_v52 = vld [vmem:[#allocation3 + $0x264] ss:$16 sps:$4 sm:$0xff]  }
  0x75   : > { %1300 = vmatpush1.bf16.msra.mxu0 %v3982_v53  ;;  %v4066_v53 = vld [vmem:[#allocation3 + $0x60] ss:$16 sps:$4 sm:$0xff]  }
  0x76   : > { %1343 = vmatpush1.bf16.msra.mxu1 %v3985_v54  ;;  %1301 = vmatprep.subr.bf16.mxu0 %v3990_v55  ;;  %v4069_v54 = vld [vmem:[#allocation3 + $0x260] ss:$16 sps:$4 sm:$0xff]   ;;  %v4074_v55 = vld [vmem:[#allocation3 + $0x44] ss:$16 sps:$4 sm:$0xff]  }
  0x77   : > { %1344 = vmatprep.subr.bf16.mxu1 %v3993_v56  ;;  %v4077_v56 = vld [vmem:[#allocation3 + $0x244] ss:$16 sps:$4 sm:$0xff]  }
  0x79   : > { %1302 = vmatpush1.bf16.msra.mxu0 %v3988_v57  ;;  %v4072_v57 = vld [vmem:[#allocation3 + $0x40] ss:$16 sps:$4 sm:$0xff]  }
  0x7a   : > { %1345 = vmatpush1.bf16.msra.mxu1 %v3991_v58  ;;  %1303 = vmatprep.subr.bf16.mxu0 %v3996_v59  ;;  %v4075_v58 = vld [vmem:[#allocation3 + $0x240] ss:$16 sps:$4 sm:$0xff]   ;;  %v4080_v59 = vld [vmem:[#allocation3 + $0x24] ss:$16 sps:$4 sm:$0xff]  }
  0x7b   : > { %1346 = vmatprep.subr.bf16.mxu1 %v3999_v60  ;;  %v4083_v60 = vld [vmem:[#allocation3 + $0x224] ss:$16 sps:$4 sm:$0xff]  }
  0x7d   : > { %1304 = vmatpush2.bf16.msra.mxu0 %v3994_v61  ;;  %v4078_v61 = vld [vmem:[#allocation3 + $0x20] ss:$16 sps:$4 sm:$0xff]  }
  0x7e   : > { %1347 = vmatpush2.bf16.msra.mxu1 %v3997_v62  ;;  %1305 = vmatprep.subr.bf16.mxu0 %v4002_v63  ;;  %v4081_v62 = vld [vmem:[#allocation3 + $0x220] ss:$16 sps:$4 sm:$0xff]   ;;  %v4086_v63 = vld [vmem:[#allocation3 + $0x4] ss:$16 sps:$4 sm:$0xff]  }
  0x7f   : > { %1348 = vmatprep.subr.bf16.mxu1 %v4005_v1  ;;  %v4089_v1 = vld [vmem:[#allocation3 + $0x204] ss:$16 sps:$4 sm:$0xff]  }
  0x81   : > { %1306 = vmatpush2.bf16.msra.mxu0 %v4000_v2  ;;  %v4084_v2 = vld [vmem:[#allocation3] ss:$16 sps:$4 sm:$0xff]  }
  0x82   : > { %1349 = vmatpush2.bf16.msra.mxu1 %v4003_v3  ;;  %1307 = vmatprep.subr.bf16.mxu0 %v4008_v4  ;;  %v4087_v3 = vld [vmem:[#allocation3 + $0x200] ss:$16 sps:$4 sm:$0xff]   ;;  %v4092_v4 = vld [vmem:[#allocation3 + $0x1e4] ss:$16 sps:$4 sm:$0xff]  }
  0x83   : > { %1350 = vmatprep.subr.bf16.mxu1 %v4011_v5  ;;  %v4095_v5 = vld [vmem:[#allocation3 + $0x3e4] ss:$16 sps:$4 sm:$0xff]  }
  0x85   : > { %1308 = vmatpush2.bf16.msra.mxu0 %v4006_v7  ;;  %v4090_v7 = vld [vmem:[#allocation3 + $0x1e0] ss:$16 sps:$4 sm:$0xff]  }
  0x86   : > { %1351 = vmatpush2.bf16.msra.mxu1 %v4009_v8  ;;  %1309 = vmatprep.subr.bf16.mxu0 %v4014_v9  ;;  %v4093_v8 = vld [vmem:[#allocation3 + $0x3e0] ss:$16 sps:$4 sm:$0xff]   ;;  %v4098_v9 = vld [vmem:[#allocation3 + $0x1c4] ss:$16 sps:$4 sm:$0xff]  }
  0x87   : > { %1352 = vmatprep.subr.bf16.mxu1 %v4017_v10  ;;  %v4101_v10 = vld [vmem:[#allocation3 + $0x3c4] ss:$16 sps:$4 sm:$0xff]  }
  0x89   : > { %1310 = vmatpush2.bf16.msra.mxu0 %v4012_v11  ;;  %v4096_v11 = vld [vmem:[#allocation3 + $0x1c0] ss:$16 sps:$4 sm:$0xff]  }
  0x8a   : > { %1353 = vmatpush2.bf16.msra.mxu1 %v4015_v12  ;;  %1311 = vmatprep.subr.bf16.mxu0 %v4020_v13  ;;  %v4099_v12 = vld [vmem:[#allocation3 + $0x3c0] ss:$16 sps:$4 sm:$0xff]   ;;  %v4104_v13 = vld [vmem:[#allocation3 + $0x1a4] ss:$16 sps:$4 sm:$0xff]  }
  0x8b   : > { %1354 = vmatprep.subr.bf16.mxu1 %v4023_v14  ;;  %v4107_v14 = vld [vmem:[#allocation3 + $0x3a4] ss:$16 sps:$4 sm:$0xff]  }
  0x8d   : > { %1312 = vmatpush2.bf16.msra.mxu0 %v4018_v15  ;;  %v4102_v15 = vld [vmem:[#allocation3 + $0x1a0] ss:$16 sps:$4 sm:$0xff]  }
  0x8e   : > { %1355 = vmatpush2.bf16.msra.mxu1 %v4021_v16  ;;  %1313 = vmatprep.subr.bf16.mxu0 %v4026_v17  ;;  %v4105_v16 = vld [vmem:[#allocation3 + $0x3a0] ss:$16 sps:$4 sm:$0xff]   ;;  %v4110_v17 = vld [vmem:[#allocation3 + $0x184] ss:$16 sps:$4 sm:$0xff]  }
  0x8f   : > { %1356 = vmatprep.subr.bf16.mxu1 %v4029_v18  ;;  %v4113_v18 = vld [vmem:[#allocation3 + $0x384] ss:$16 sps:$4 sm:$0xff]  }
  0x91   : > { %1314 = vmatpush2.bf16.msra.mxu0 %v4024_v19  ;;  %v4108_v19 = vld [vmem:[#allocation3 + $0x180] ss:$16 sps:$4 sm:$0xff]  }
  0x92   : > { %1357 = vmatpush2.bf16.msra.mxu1 %v4027_v20  ;;  %1315 = vmatprep.subr.bf16.mxu0 %v4032_v23  ;;  %v4111_v20 = vld [vmem:[#allocation3 + $0x380] ss:$16 sps:$4 sm:$0xff]   ;;  %v4116_v23 = vld [vmem:[#allocation3 + $0x164] ss:$16 sps:$4 sm:$0xff]  }
  0x93   : > { %1358 = vmatprep.subr.bf16.mxu1 %v4035_v24  ;;  %v4119_v24 = vld [vmem:[#allocation3 + $0x364] ss:$16 sps:$4 sm:$0xff]  }
  0x95   : > { %1316 = vmatpush2.bf16.msra.mxu0 %v4030_v27  ;;  %v4114_v27 = vld [vmem:[#allocation3 + $0x160] ss:$16 sps:$4 sm:$0xff]  }
  0x96   : > { %1359 = vmatpush2.bf16.msra.mxu1 %v4033_v28  ;;  %1317 = vmatprep.subr.bf16.mxu0 %v4038_v29  ;;  %v4117_v28 = vld [vmem:[#allocation3 + $0x360] ss:$16 sps:$4 sm:$0xff]   ;;  %v4122_v29 = vld [vmem:[#allocation3 + $0x144] ss:$16 sps:$4 sm:$0xff]  }
  0x97   : > { %1360 = vmatprep.subr.bf16.mxu1 %v4041_v30  ;;  %v4125_v30 = vld [vmem:[#allocation3 + $0x344] ss:$16 sps:$4 sm:$0xff]  }
  0x99   : > { %1318 = vmatpush2.bf16.msra.mxu0 %v4036_v33  ;;  %v4120_v33 = vld [vmem:[#allocation3 + $0x140] ss:$16 sps:$4 sm:$0xff]  }
  0x9a   : > { %1361 = vmatpush2.bf16.msra.mxu1 %v4039_v34  ;;  %2013 = vmatprep.subr.bf16.mxu0 %v4044_v35  ;;  %v4123_v34 = vld [vmem:[#allocation3 + $0x340] ss:$16 sps:$4 sm:$0xff]   ;;  %v4128_v35 = vld [vmem:[#allocation3 + $0x124] ss:$16 sps:$4 sm:$0xff]  }
  0x9b   : > { %2056 = vmatprep.subr.bf16.mxu1 %v4047_v36  ;;  %v4131_v36 = vld [vmem:[#allocation3 + $0x324] ss:$16 sps:$4 sm:$0xff]  }
  0x9c   : > { %1320 = vmatmul.mubr.bf16.vlgmr.msra.gmra.mxu0 %v4570_v21  ;;  %v4054_v21 = vld [vmem:[#allocation3 + $0xa0] ss:$16 sps:$4 sm:$0xff]  }
  0x9d   : > { %1363 = vmatmul.mubr.bf16.vlgmr.msra.gmra.mxu1 %v4572_v22  ;;  %2014 = vmatpush1.bf16.msra.mxu0 %v4042_v37  ;;  %v4057_v22 = vld [vmem:[#allocation3 + $0x2a0] ss:$16 sps:$4 sm:$0xff]  }
  0x9e   : > { %2057 = vmatpush1.bf16.msra.mxu1 %v4045_v38  ;;  %2015 = vmatprep.subr.bf16.mxu0 %v4050_v39  ;;  %v4126_v37 = vld [vmem:[#allocation3 + $0x120] ss:$16 sps:$4 sm:$0xff]   ;;  %v4134_v39 = vld [vmem:[#allocation3 + $0x104] ss:$16 sps:$4 sm:$0xff]  }
  0x9f   : > { %2058 = vmatprep.subr.bf16.mxu1 %v4053_v40  ;;  %2045 = vmatprep.mubr.bf16.mxu0 %v4597_v42  ;;  %v4129_v38 = vld [vmem:[#allocation3 + $0x320] ss:$16 sps:$4 sm:$0xff]   ;;  %v4137_v40 = vld [vmem:[#allocation3 + $0x304] ss:$16 sps:$4 sm:$0xff]  }
  0xa0   : > { %2088 = vmatprep.mubr.bf16.mxu1 %v4600_v46 }
  0xa1   : > { %2016 = vmatpush1.bf16.msra.mxu0 %v4048_v44  ;;  %v264_v44 = vld [vmem:[#allocation2] sm:$0xff] }
  0xa2   : > { %2059 = vmatpush1.bf16.msra.mxu1 %v4051_v45  ;;  %2017 = vmatprep.subr.bf16.mxu0 %v4056_v47  ;;  %v266_v45 = vld [vmem:[#allocation2 + $0x10] sm:$0xff]  ;;  %v4140_v47 = vld [vmem:[#allocation3 + $0xec] ss:$16 sps:$4 sm:$0xff]  }
  0xa3   : > { %2060 = vmatprep.subr.bf16.mxu1 %v4059_v48  ;;  %v4143_v48 = vld [vmem:[#allocation3 + $0x2ec] ss:$16 sps:$4 sm:$0xff]  }
  0xa5   : > { %2018 = vmatpush1.bf16.msra.mxu0 %v4054_v21  ;;  %v4605_v21 = vpack.c.bf16 %v4583_v31, %v264_v44  ;;  %v4147_v31 = vld [vmem:[#allocation3 + $0x2c8] ss:$16 sps:$4 sm:$0xff]  }
  0xa6   : > { %2061 = vmatpush1.bf16.msra.mxu1 %v4057_v22  ;;  %2019 = vmatprep.subr.bf16.mxu0 %v4062_v25  ;;  %v4608_v22 = vpack.c.bf16 %v4587_v32, %v266_v45  ;;  %v4138_v25 = vld [vmem:[#allocation3 + $0xe8] ss:$16 sps:$4 sm:$0xff]   ;;  %v4152_v32 = vld [vmem:[#allocation3 + $0xac] ss:$16 sps:$4 sm:$0xff]  }
  0xa7   : > { %2062 = vmatprep.subr.bf16.mxu1 %v4065_v49  ;;  %v4141_v49 = vld [vmem:[#allocation3 + $0x2e8] ss:$16 sps:$4 sm:$0xff]  }
  0xa8   : > { %v289_v44 = vld [vmem:[#allocation2 + $0x8] sm:$0xfc]  ;;  %v291_v45 = vld [vmem:[#allocation2 + $0x18] sm:$0xfc] }
  0xa9   : > { %2020 = vmatpush1.bf16.msra.mxu0 %v4060_v26  ;;  %v4146_v26 = vld [vmem:[#allocation3 + $0xcc] ss:$16 sps:$4 sm:$0xff]  }
  0xaa   : > { %2063 = vmatpush1.bf16.msra.mxu1 %v4063_v50  ;;  %2021 = vmatprep.subr.bf16.mxu0 %v4068_v51  ;;  %v4149_v50 = vld [vmem:[#allocation3 + $0x2cc] ss:$16 sps:$4 sm:$0xff]   ;;  %v4144_v51 = vld [vmem:[#allocation3 + $0xc8] ss:$16 sps:$4 sm:$0xff]  }
  0xab   : > { %2064 = vmatprep.subr.bf16.mxu1 %v4071_v52  ;;  %v4155_v52 = vld [vmem:[#allocation3 + $0x2ac] ss:$16 sps:$4 sm:$0xff]  }
  0xad   : > { %2022 = vmatpush1.bf16.msra.mxu0 %v4066_v53  ;;  %v4150_v53 = vld [vmem:[#allocation3 + $0xa8] ss:$16 sps:$4 sm:$0xff]  }
  0xae   : > { %2065 = vmatpush1.bf16.msra.mxu1 %v4069_v54  ;;  %2023 = vmatprep.subr.bf16.mxu0 %v4074_v55  ;;  %v4153_v54 = vld [vmem:[#allocation3 + $0x2a8] ss:$16 sps:$4 sm:$0xff]   ;;  %v4158_v55 = vld [vmem:[#allocation3 + $0x8c] ss:$16 sps:$4 sm:$0xff]  }
  0xaf   : > { %2066 = vmatprep.subr.bf16.mxu1 %v4077_v56  ;;  %v4161_v56 = vld [vmem:[#allocation3 + $0x28c] ss:$16 sps:$4 sm:$0xff]  }
  0xb1   : > { %2024 = vmatpush1.bf16.msra.mxu0 %v4072_v57  ;;  %v4156_v57 = vld [vmem:[#allocation3 + $0x88] ss:$16 sps:$4 sm:$0xff]  }
  0xb2   : > { %2067 = vmatpush1.bf16.msra.mxu1 %v4075_v58  ;;  %2025 = vmatprep.subr.bf16.mxu0 %v4080_v59  ;;  %v4159_v58 = vld [vmem:[#allocation3 + $0x288] ss:$16 sps:$4 sm:$0xff]   ;;  %v4164_v59 = vld [vmem:[#allocation3 + $0x6c] ss:$16 sps:$4 sm:$0xff]  }
  0xb3   : > { %2068 = vmatprep.subr.bf16.mxu1 %v4083_v60  ;;  %v4167_v60 = vld [vmem:[#allocation3 + $0x26c] ss:$16 sps:$4 sm:$0xff]  }
  0xb5   : > { %2026 = vmatpush1.bf16.msra.mxu0 %v4078_v61  ;;  %v4170_v61 = vld [vmem:[#allocation3 + $0x4c] ss:$16 sps:$4 sm:$0xff]  }
  0xb6   : > { %2069 = vmatpush1.bf16.msra.mxu1 %v4081_v62  ;;  %2027 = vmatprep.subr.bf16.mxu0 %v4086_v63  ;;  %v4173_v62 = vld [vmem:[#allocation3 + $0x24c] ss:$16 sps:$4 sm:$0xff]   ;;  %v4168_v63 = vld [vmem:[#allocation3 + $0x48] ss:$16 sps:$4 sm:$0xff]  }
  0xb7   : > { %2070 = vmatprep.subr.bf16.mxu1 %v4089_v1  ;;  %v4171_v1 = vld [vmem:[#allocation3 + $0x248] ss:$16 sps:$4 sm:$0xff]  }
  0xb9   : > { %2028 = vmatpush1.bf16.msra.mxu0 %v4084_v2  ;;  %v4176_v2 = vld [vmem:[#allocation3 + $0x2c] ss:$16 sps:$4 sm:$0xff]  }
  0xba   : > { %2071 = vmatpush1.bf16.msra.mxu1 %v4087_v3  ;;  %2029 = vmatprep.subr.bf16.mxu0 %v4092_v4  ;;  %v4179_v3 = vld [vmem:[#allocation3 + $0x22c] ss:$16 sps:$4 sm:$0xff]   ;;  %v4174_v4 = vld [vmem:[#allocation3 + $0x28] ss:$16 sps:$4 sm:$0xff]  }
  0xbb   : > { %2072 = vmatprep.subr.bf16.mxu1 %v4095_v5  ;;  %v4177_v5 = vld [vmem:[#allocation3 + $0x228] ss:$16 sps:$4 sm:$0xff]  }
  0xbd   : > { %2030 = vmatpush2.bf16.msra.mxu0 %v4090_v7  ;;  %v4182_v7 = vld [vmem:[#allocation3 + $0xc] ss:$16 sps:$4 sm:$0xff]  }
  0xbe   : > { %2073 = vmatpush2.bf16.msra.mxu1 %v4093_v8  ;;  %2031 = vmatprep.subr.bf16.mxu0 %v4098_v9  ;;  %v4185_v8 = vld [vmem:[#allocation3 + $0x20c] ss:$16 sps:$4 sm:$0xff]   ;;  %v4180_v9 = vld [vmem:[#allocation3 + $0x8] ss:$16 sps:$4 sm:$0xff]  }
  0xbf   : > { %2074 = vmatprep.subr.bf16.mxu1 %v4101_v10  ;;  %v4183_v10 = vld [vmem:[#allocation3 + $0x208] ss:$16 sps:$4 sm:$0xff]  }
  0xc1   : > { %2032 = vmatpush2.bf16.msra.mxu0 %v4096_v11  ;;  %v4188_v11 = vld [vmem:[#allocation3 + $0x1ec] ss:$16 sps:$4 sm:$0xff]  }
  0xc2   : > { %2075 = vmatpush2.bf16.msra.mxu1 %v4099_v12  ;;  %2033 = vmatprep.subr.bf16.mxu0 %v4104_v13  ;;  %v4191_v12 = vld [vmem:[#allocation3 + $0x3ec] ss:$16 sps:$4 sm:$0xff]   ;;  %v4186_v13 = vld [vmem:[#allocation3 + $0x1e8] ss:$16 sps:$4 sm:$0xff]  }
  0xc3   : > { %2076 = vmatprep.subr.bf16.mxu1 %v4107_v14  ;;  %v4189_v14 = vld [vmem:[#allocation3 + $0x3e8] ss:$16 sps:$4 sm:$0xff]  }
  0xc5   : > { %2034 = vmatpush2.bf16.msra.mxu0 %v4102_v15  ;;  %v4194_v15 = vld [vmem:[#allocation3 + $0x1cc] ss:$16 sps:$4 sm:$0xff]  }
  0xc6   : > { %2077 = vmatpush2.bf16.msra.mxu1 %v4105_v16  ;;  %2035 = vmatprep.subr.bf16.mxu0 %v4110_v17  ;;  %v4197_v16 = vld [vmem:[#allocation3 + $0x3cc] ss:$16 sps:$4 sm:$0xff]   ;;  %v4192_v17 = vld [vmem:[#allocation3 + $0x1c8] ss:$16 sps:$4 sm:$0xff]  }
  0xc7   : > { %2078 = vmatprep.subr.bf16.mxu1 %v4113_v18  ;;  %v4195_v18 = vld [vmem:[#allocation3 + $0x3c8] ss:$16 sps:$4 sm:$0xff]  }
  0xc9   : > { %2036 = vmatpush2.bf16.msra.mxu0 %v4108_v19  ;;  %v4200_v19 = vld [vmem:[#allocation3 + $0x1ac] ss:$16 sps:$4 sm:$0xff]  }
  0xca   : > { %2079 = vmatpush2.bf16.msra.mxu1 %v4111_v20  ;;  %2037 = vmatprep.subr.bf16.mxu0 %v4116_v23  ;;  %v4203_v20 = vld [vmem:[#allocation3 + $0x3ac] ss:$16 sps:$4 sm:$0xff]   ;;  %v4198_v23 = vld [vmem:[#allocation3 + $0x1a8] ss:$16 sps:$4 sm:$0xff]  }
  0xcb   : > { %2080 = vmatprep.subr.bf16.mxu1 %v4119_v24  ;;  %v4201_v24 = vld [vmem:[#allocation3 + $0x3a8] ss:$16 sps:$4 sm:$0xff]  }
  0xcd   : > { %2038 = vmatpush2.bf16.msra.mxu0 %v4114_v27  ;;  %v4206_v27 = vld [vmem:[#allocation3 + $0x18c] ss:$16 sps:$4 sm:$0xff]  }
  0xce   : > { %2081 = vmatpush2.bf16.msra.mxu1 %v4117_v28  ;;  %2039 = vmatprep.subr.bf16.mxu0 %v4122_v29  ;;  %v4209_v28 = vld [vmem:[#allocation3 + $0x38c] ss:$16 sps:$4 sm:$0xff]   ;;  %v4204_v29 = vld [vmem:[#allocation3 + $0x188] ss:$16 sps:$4 sm:$0xff]  }
  0xcf   : > { %2082 = vmatprep.subr.bf16.mxu1 %v4125_v30  ;;  %v4207_v30 = vld [vmem:[#allocation3 + $0x388] ss:$16 sps:$4 sm:$0xff]  }
  0xd1   : > { %2040 = vmatpush2.bf16.msra.mxu0 %v4120_v33  ;;  %v4212_v33 = vld [vmem:[#allocation3 + $0x16c] ss:$16 sps:$4 sm:$0xff]  }
  0xd2   : > { %2083 = vmatpush2.bf16.msra.mxu1 %v4123_v34  ;;  %2041 = vmatprep.subr.bf16.mxu0 %v4128_v35  ;;  %v4215_v34 = vld [vmem:[#allocation3 + $0x36c] ss:$16 sps:$4 sm:$0xff]   ;;  %v4210_v35 = vld [vmem:[#allocation3 + $0x168] ss:$16 sps:$4 sm:$0xff]  }
  0xd3   : > { %2084 = vmatprep.subr.bf16.mxu1 %v4131_v36  ;;  %v4213_v36 = vld [vmem:[#allocation3 + $0x368] ss:$16 sps:$4 sm:$0xff]  }
  0xd5   : > { %2042 = vmatpush2.bf16.msra.mxu0 %v4126_v37  ;;  %v4218_v37 = vld [vmem:[#allocation3 + $0x14c] ss:$16 sps:$4 sm:$0xff]  }
  0xd6   : > { %2085 = vmatpush2.bf16.msra.mxu1 %v4129_v38  ;;  %2043 = vmatprep.subr.bf16.mxu0 %v4134_v39  ;;  %v4221_v38 = vld [vmem:[#allocation3 + $0x34c] ss:$16 sps:$4 sm:$0xff]   ;;  %v4216_v39 = vld [vmem:[#allocation3 + $0x148] ss:$16 sps:$4 sm:$0xff]  }
  0xd7   : > { %2086 = vmatprep.subr.bf16.mxu1 %v4137_v40  ;;  %v4219_v40 = vld [vmem:[#allocation3 + $0x348] ss:$16 sps:$4 sm:$0xff]  }
  0xd9   : > { %2044 = vmatpush2.bf16.msra.mxu0 %v4132_v41  ;;  %v4224_v41 = vld [vmem:[#allocation3 + $0x12c] ss:$16 sps:$4 sm:$0xff]  }
  0xda   : > { %2087 = vmatpush2.bf16.msra.mxu1 %v4135_v43  ;;  %2099 = vmatprep.subr.bf16.mxu0 %v4140_v47  ;;  %v4227_v43 = vld [vmem:[#allocation3 + $0x32c] ss:$16 sps:$4 sm:$0xff]   ;;  %v4222_v47 = vld [vmem:[#allocation3 + $0x128] ss:$16 sps:$4 sm:$0xff]  }
  0xdb   : > { %2142 = vmatprep.subr.bf16.mxu1 %v4143_v48  ;;  %v4225_v48 = vld [vmem:[#allocation3 + $0x328] ss:$16 sps:$4 sm:$0xff]  }
  0xdc   : > { %2046 = vmatmul.mubr.bf16.vlgmr.msra.gmra.mxu0 %v4605_v21 }
  0xdd   : > { %2089 = vmatmul.mubr.bf16.vlgmr.msra.gmra.mxu1 %v4608_v22  ;;  %2100 = vmatpush1.bf16.msra.mxu0 %v4138_v25  ;;  %v293_v25 = vld [vmem:[#allocation2 + $0x48] sm:$0x3] }
  0xde   : > { %2143 = vmatpush1.bf16.msra.mxu1 %v4141_v49  ;;  %2101 = vmatprep.subr.bf16.mxu0 %v4146_v26  ;;  %v295_v49 = vld [vmem:[#allocation2 + $0x58] sm:$0x3]  ;;  %v4230_v26 = vld [vmem:[#allocation3 + $0x10c] ss:$16 sps:$4 sm:$0xff]  }
  0xdf   : > { %2144 = vmatprep.subr.bf16.mxu1 %v4149_v50  ;;  %2131 = vmatprep.mubr.bf16.mxu0 %v4597_v42  ;;  %v4162_v42 = vld [vmem:[#allocation3 + $0x68] ss:$16 sps:$4 sm:$0xff]   ;;  %v4233_v50 = vld [vmem:[#allocation3 + $0x30c] ss:$16 sps:$4 sm:$0xff]  }
  0xe0   : > { %2174 = vmatprep.mubr.bf16.mxu1 %v4600_v46  ;;  %v4165_v46 = vld [vmem:[#allocation3 + $0x268] ss:$16 sps:$4 sm:$0xff]  }
  0xe1   : > { %2102 = vmatpush1.bf16.msra.mxu0 %v4144_v51  ;;  %v4426_v51 = vld [vmem:[#allocation2 + $0x28] sm:$0xff] }
  0xe2   : > { %2145 = vmatpush1.bf16.msra.mxu1 %v4147_v31  ;;  %2103 = vmatprep.subr.bf16.mxu0 %v4152_v32  ;;  %v297_v31 = vpack.c.bf16 %v4426_v51, %v289_v44  ;;  %v4427_v32 = vld [vmem:[#allocation2 + $0x38] sm:$0xff]  ;;  %v4296_v44 = vld [vmem:[#allocation3 + $0x9a4] ss:$16 sps:$4 sm:$0xff]  }
  0xe3   : > { %2146 = vmatprep.subr.bf16.mxu1 %v4155_v52  ;;  %v299_v52 = vpack.c.bf16 %v4427_v32, %v291_v45  ;;  %v4299_v45 = vld [vmem:[#allocation3 + $0xba4] ss:$16 sps:$4 sm:$0xff]   ;;  %v4306_v32 = vld [vmem:[#allocation3 + $0x960] ss:$16 sps:$4 sm:$0xff]  }
  0xe4   : > { %v4308_v51 = vld [vmem:[#allocation3 + $0x964] ss:$16 sps:$4 sm:$0xff]  }
  0xe5   : > { %2104 = vmatpush1.bf16.msra.mxu0 %v4150_v53  ;;  %v301_v53 = vpack.c.bf16 %v293_v25, %v293_v25  ;;  %v4302_v25 = vld [vmem:[#allocation3 + $0x984] ss:$16 sps:$4 sm:$0xff]  }
  0xe6   : > { %2147 = vmatpush1.bf16.msra.mxu1 %v4153_v54  ;;  %2105 = vmatprep.subr.bf16.mxu0 %v4158_v55  ;;  %v303_v54 = vpack.c.bf16 %v295_v49, %v295_v49  ;;  %v4228_v55 = vld [vmem:[#allocation3 + $0x108] ss:$16 sps:$4 sm:$0xff]   ;;  %v4305_v49 = vld [vmem:[#allocation3 + $0xb84] ss:$16 sps:$4 sm:$0xff]  }
  0xe7   : > { %2148 = vmatprep.subr.bf16.mxu1 %v4161_v56  ;;  %v4231_v56 = vld [vmem:[#allocation3 + $0x308] ss:$16 sps:$4 sm:$0xff]  }
  0xe9   : > { %2106 = vmatpush1.bf16.msra.mxu0 %v4156_v57  ;;  %v4236_v57 = vld [vmem:[#allocation3 + $0x8e4] ss:$16 sps:$4 sm:$0xff]  }
  0xea   : > { %2149 = vmatpush1.bf16.msra.mxu1 %v4159_v58  ;;  %2107 = vmatprep.subr.bf16.mxu0 %v4164_v59  ;;  %v4239_v58 = vld [vmem:[#allocation3 + $0xae4] ss:$16 sps:$4 sm:$0xff]   ;;  %v2326_v59 = vrot.slane %v297_v31, 1 }
  0xeb   : > { %2150 = vmatprep.subr.bf16.mxu1 %v4167_v60  ;;  %v2327_v60 = vrot.slane %v301_v53, 1  ;;  %v4311_v31 = vld [vmem:[#allocation3 + $0xb64] ss:$16 sps:$4 sm:$0xff]  }
  0xec   : > { %v4314_v53 = vld [vmem:[#allocation3 + $0x944] ss:$16 sps:$4 sm:$0xff]  }
  0xed   : > { %2108 = vmatpush1.bf16.msra.mxu0 %v4162_v42  ;;  %v2332_v42 = vrot.slane %v299_v52, 1  ;;  %v4309_v52 = vld [vmem:[#allocation3 + $0xb60] ss:$16 sps:$4 sm:$0xff]  }
  0xee   : > { %2151 = vmatpush1.bf16.msra.mxu1 %v4165_v46  ;;  %2109 = vmatprep.subr.bf16.mxu0 %v4170_v61  ;;  %v2333_v46 = vrot.slane %v303_v54, 1  ;;  %v4234_v61 = vld [vmem:[#allocation3 + $0x8e0] ss:$16 sps:$4 sm:$0xff]   ;;  %v4317_v54 = vld [vmem:[#allocation3 + $0xb44] ss:$16 sps:$4 sm:$0xff]  }
  0xef   : > { %2152 = vmatprep.subr.bf16.mxu1 %v4173_v62  ;;  %v4237_v62 = vld [vmem:[#allocation3 + $0xae0] ss:$16 sps:$4 sm:$0xff]  }
  0xf1   : > { %2110 = vmatpush1.bf16.msra.mxu0 %v4168_v63  ;;  %v4242_v63 = vld [vmem:[#allocation3 + $0x8c4] ss:$16 sps:$4 sm:$0xff]  }
  0xf2   : > { %2153 = vmatpush1.bf16.msra.mxu1 %v4171_v1  ;;  %2111 = vmatprep.subr.bf16.mxu0 %v4176_v2  ;;  %v4245_v1 = vld [vmem:[#allocation3 + $0xac4] ss:$16 sps:$4 sm:$0xff]   ;;  %v4617_v2 = vsel %vm2322_vm2, %v2326_v59, %v2327_v60 }
  0xf3   : > { %2154 = vmatprep.subr.bf16.mxu1 %v4179_v3  ;;  %v4620_v3 = vsel %vm2322_vm2, %v2332_v42, %v2333_v46  ;;  %v288_v59 = vld [vmem:[#allocation2] sm:$0xfc]  ;;  %v292_v46 = vld [vmem:[#allocation2 + $0x40] sm:$0x3] }
  0xf5   : > { %2112 = vmatpush1.bf16.msra.mxu0 %v4174_v4  ;;  %v4240_v4 = vld [vmem:[#allocation3 + $0x8c0] ss:$16 sps:$4 sm:$0xff]  }
  0xf6   : > { %2155 = vmatpush1.bf16.msra.mxu1 %v4177_v5  ;;  %2113 = vmatprep.subr.bf16.mxu0 %v4182_v7  ;;  %v4243_v5 = vld [vmem:[#allocation3 + $0xac0] ss:$16 sps:$4 sm:$0xff]   ;;  %v4248_v7 = vld [vmem:[#allocation3 + $0x8a4] ss:$16 sps:$4 sm:$0xff]  }
  0xf7   : > { %2156 = vmatprep.subr.bf16.mxu1 %v4185_v8  ;;  %v4251_v8 = vld [vmem:[#allocation3 + $0xaa4] ss:$16 sps:$4 sm:$0xff]  }
  0xf9   : > { %2114 = vmatpush1.bf16.msra.mxu0 %v4180_v9  ;;  %v4254_v9 = vld [vmem:[#allocation3 + $0x884] ss:$16 sps:$4 sm:$0xff]  }
  0xfa   : > { %2157 = vmatpush1.bf16.msra.mxu1 %v4183_v10  ;;  %2115 = vmatprep.subr.bf16.mxu0 %v4188_v11  ;;  %v4257_v10 = vld [vmem:[#allocation3 + $0xa84] ss:$16 sps:$4 sm:$0xff]   ;;  %v4252_v11 = vld [vmem:[#allocation3 + $0x880] ss:$16 sps:$4 sm:$0xff]  }
  0xfb   : > { %2158 = vmatprep.subr.bf16.mxu1 %v4191_v12  ;;  %v4255_v12 = vld [vmem:[#allocation3 + $0xa80] ss:$16 sps:$4 sm:$0xff]  }
  0xfd   : > { %2116 = vmatpush2.bf16.msra.mxu0 %v4186_v13  ;;  %v4260_v13 = vld [vmem:[#allocation3 + $0x864] ss:$16 sps:$4 sm:$0xff]  }
  0xfe   : > { %2159 = vmatpush2.bf16.msra.mxu1 %v4189_v14  ;;  %2117 = vmatprep.subr.bf16.mxu0 %v4194_v15  ;;  %v4263_v14 = vld [vmem:[#allocation3 + $0xa64] ss:$16 sps:$4 sm:$0xff]   ;;  %v4258_v15 = vld [vmem:[#allocation3 + $0x860] ss:$16 sps:$4 sm:$0xff]  }
  0xff   : > { %2160 = vmatprep.subr.bf16.mxu1 %v4197_v16  ;;  %v4261_v16 = vld [vmem:[#allocation3 + $0xa60] ss:$16 sps:$4 sm:$0xff]  }
 0x101   : > { %2118 = vmatpush2.bf16.msra.mxu0 %v4192_v17  ;;  %v4266_v17 = vld [vmem:[#allocation3 + $0x844] ss:$16 sps:$4 sm:$0xff]  }
 0x102   : > { %2161 = vmatpush2.bf16.msra.mxu1 %v4195_v18  ;;  %2119 = vmatprep.subr.bf16.mxu0 %v4200_v19  ;;  %v4269_v18 = vld [vmem:[#allocation3 + $0xa44] ss:$16 sps:$4 sm:$0xff]   ;;  %v4264_v19 = vld [vmem:[#allocation3 + $0x840] ss:$16 sps:$4 sm:$0xff]  }
 0x103   : > { %2162 = vmatprep.subr.bf16.mxu1 %v4203_v20  ;;  %v4267_v20 = vld [vmem:[#allocation3 + $0xa40] ss:$16 sps:$4 sm:$0xff]  }
 0x105   : > { %2120 = vmatpush2.bf16.msra.mxu0 %v4198_v23  ;;  %v4272_v23 = vld [vmem:[#allocation3 + $0x824] ss:$16 sps:$4 sm:$0xff]  }
 0x106   : > { %2163 = vmatpush2.bf16.msra.mxu1 %v4201_v24  ;;  %2121 = vmatprep.subr.bf16.mxu0 %v4206_v27  ;;  %v4275_v24 = vld [vmem:[#allocation3 + $0xa24] ss:$16 sps:$4 sm:$0xff]   ;;  %v4270_v27 = vld [vmem:[#allocation3 + $0x820] ss:$16 sps:$4 sm:$0xff]  }
 0x107   : > { %2164 = vmatprep.subr.bf16.mxu1 %v4209_v28  ;;  %v4273_v28 = vld [vmem:[#allocation3 + $0xa20] ss:$16 sps:$4 sm:$0xff]  }
 0x109   : > { %2122 = vmatpush2.bf16.msra.mxu0 %v4204_v29  ;;  %v4278_v29 = vld [vmem:[#allocation3 + $0x804] ss:$16 sps:$4 sm:$0xff]  }
 0x10a   : > { %2165 = vmatpush2.bf16.msra.mxu1 %v4207_v30  ;;  %2123 = vmatprep.subr.bf16.mxu0 %v4212_v33  ;;  %v4281_v30 = vld [vmem:[#allocation3 + $0xa04] ss:$16 sps:$4 sm:$0xff]   ;;  %v4276_v33 = vld [vmem:[#allocation3 + $0x800] ss:$16 sps:$4 sm:$0xff]  }
 0x10b   : > { %2166 = vmatprep.subr.bf16.mxu1 %v4215_v34  ;;  %v4279_v34 = vld [vmem:[#allocation3 + $0xa00] ss:$16 sps:$4 sm:$0xff]  }
 0x10d   : > { %2124 = vmatpush2.bf16.msra.mxu0 %v4210_v35  ;;  %v4284_v35 = vld [vmem:[#allocation3 + $0x9e4] ss:$16 sps:$4 sm:$0xff]  }
 0x10e   : > { %2167 = vmatpush2.bf16.msra.mxu1 %v4213_v36  ;;  %2125 = vmatprep.subr.bf16.mxu0 %v4218_v37  ;;  %v4287_v36 = vld [vmem:[#allocation3 + $0xbe4] ss:$16 sps:$4 sm:$0xff]   ;;  %v4282_v37 = vld [vmem:[#allocation3 + $0x9e0] ss:$16 sps:$4 sm:$0xff]  }
 0x10f   : > { %2168 = vmatprep.subr.bf16.mxu1 %v4221_v38  ;;  %v4285_v38 = vld [vmem:[#allocation3 + $0xbe0] ss:$16 sps:$4 sm:$0xff]  }
 0x111   : > { %2126 = vmatpush2.bf16.msra.mxu0 %v4216_v39  ;;  %v4290_v39 = vld [vmem:[#allocation3 + $0x9c4] ss:$16 sps:$4 sm:$0xff]  }
 0x112   : > { %2169 = vmatpush2.bf16.msra.mxu1 %v4219_v40  ;;  %2127 = vmatprep.subr.bf16.mxu0 %v4224_v41  ;;  %v4293_v40 = vld [vmem:[#allocation3 + $0xbc4] ss:$16 sps:$4 sm:$0xff]   ;;  %v4288_v41 = vld [vmem:[#allocation3 + $0x9c0] ss:$16 sps:$4 sm:$0xff]  }
 0x113   : > { %2170 = vmatprep.subr.bf16.mxu1 %v4227_v43  ;;  %v4291_v43 = vld [vmem:[#allocation3 + $0xbc0] ss:$16 sps:$4 sm:$0xff]  }
 0x115   : > { %2128 = vmatpush2.bf16.msra.mxu0 %v4222_v47  ;;  %v4294_v47 = vld [vmem:[#allocation3 + $0x9a0] ss:$16 sps:$4 sm:$0xff]  }
 0x116   : > { %2171 = vmatpush2.bf16.msra.mxu1 %v4225_v48  ;;  %2129 = vmatprep.subr.bf16.mxu0 %v4230_v26  ;;  %v4297_v48 = vld [vmem:[#allocation3 + $0xba0] ss:$16 sps:$4 sm:$0xff]  }
 0x117   : > { %2172 = vmatprep.subr.bf16.mxu1 %v4233_v50  ;;  %v4300_v26 = vld [vmem:[#allocation3 + $0x980] ss:$16 sps:$4 sm:$0xff]  }
 0x118   : > { %v4303_v50 = vld [vmem:[#allocation3 + $0xb80] ss:$16 sps:$4 sm:$0xff]  }
 0x119   : > { %2130 = vmatpush2.bf16.msra.mxu0 %v4228_v55  ;;  %v4312_v55 = vld [vmem:[#allocation3 + $0x940] ss:$16 sps:$4 sm:$0xff]  }
 0x11a   : > { %2173 = vmatpush2.bf16.msra.mxu1 %v4231_v56  ;;  %2979 = vmatprep.subr.bf16.mxu0 %v4236_v57  ;;  %v4315_v56 = vld [vmem:[#allocation3 + $0xb40] ss:$16 sps:$4 sm:$0xff]   ;;  %v4320_v57 = vld [vmem:[#allocation3 + $0x924] ss:$16 sps:$4 sm:$0xff]  }
 0x11b   : > { %3022 = vmatprep.subr.bf16.mxu1 %v4239_v58  ;;  %v4323_v58 = vld [vmem:[#allocation3 + $0xb24] ss:$16 sps:$4 sm:$0xff]  }
 0x11c   : > { %2132 = vmatmul.mubr.bf16.vlgmr.msra.gmra.mxu0 %v4605_v21  ;;  %v4246_v21 = vld [vmem:[#allocation3 + $0x8a0] ss:$16 sps:$4 sm:$0xff]   ;;  %v4624_v60 = vpop.f32.mrf.mxu0 }
 0x11d   : > { %2175 = vmatmul.mubr.bf16.vlgmr.msra.gmra.mxu1 %v4608_v22  ;;  %2980 = vmatpush1.bf16.msra.mxu0 %v4234_v61  ;;  %v4249_v22 = vld [vmem:[#allocation3 + $0xaa0] ss:$16 sps:$4 sm:$0xff]   ;;  %v4626_v42 = vpop.f32.mrf.mxu1 }
 0x11e   : > { %3023 = vmatpush1.bf16.msra.mxu1 %v4237_v62  ;;  %2981 = vmatprep.subr.bf16.mxu0 %v4242_v63  ;;  %v290_v61 = vld [vmem:[#allocation2 + $0x10] sm:$0xfc]  ;;  %v294_v62 = vld [vmem:[#allocation2 + $0x50] sm:$0x3]  ;;  %v4428_v63 = vld [vmem:[#allocation2 + $0x20] sm:$0xff] }
 0x11f   : > { %3024 = vmatprep.subr.bf16.mxu1 %v4245_v1  ;;  %3011 = vmatprep.mubr.bf16.mxu0 %v4617_v2  ;;  %v296_v1 = vpack.c.bf16 %v4428_v63, %v288_v59  ;;  %v4362_v59 = vld [vmem:[#allocation3 + $0x84c] ss:$16 sps:$4 sm:$0xff]  }
 0x120   : > { %3054 = vmatprep.mubr.bf16.mxu1 %v4620_v3  ;;  %v4368_v63 = vld [vmem:[#allocation3 + $0x82c] ss:$16 sps:$4 sm:$0xff]  }
 0x121   : > { %2982 = vmatpush1.bf16.msra.mxu0 %v4240_v4  ;;  %v4318_v4 = vld [vmem:[#allocation3 + $0x920] ss:$16 sps:$4 sm:$0xff]  }
 0x122   : > { %3025 = vmatpush1.bf16.msra.mxu1 %v4243_v5  ;;  %2983 = vmatprep.subr.bf16.mxu0 %v4248_v7  ;;  %v4321_v5 = vld [vmem:[#allocation3 + $0xb20] ss:$16 sps:$4 sm:$0xff]   ;;  %v300_v7 = vpack.c.bf16 %v292_v46, %v292_v46  ;;  %v4365_v46 = vld [vmem:[#allocation3 + $0xa4c] ss:$16 sps:$4 sm:$0xff]  }
 0x123   : > { %3026 = vmatprep.subr.bf16.mxu1 %v4251_v8  ;;  %v4429_v8 = vld [vmem:[#allocation2 + $0x30] sm:$0xff] }
 0x125   : > { %2984 = vmatpush1.bf16.msra.mxu0 %v4246_v21  ;;  %v298_v21 = vpack.c.bf16 %v4429_v8, %v290_v61  ;;  %v4360_v61 = vld [vmem:[#allocation3 + $0x848] ss:$16 sps:$4 sm:$0xff]   ;;  %v4377_v8 = vld [vmem:[#allocation3 + $0xa0c] ss:$16 sps:$4 sm:$0xff]  }
 0x126   : > { %3027 = vmatpush1.bf16.msra.mxu1 %v4249_v22  ;;  %2985 = vmatprep.subr.bf16.mxu0 %v4254_v9  ;;  %v302_v22 = vpack.c.bf16 %v294_v62, %v294_v62  ;;  %v4628_v9 = vpop.f32.mrf.mxu0  ;;  %v4363_v62 = vld [vmem:[#allocation3 + $0xa48] ss:$16 sps:$4 sm:$0xff]  }
 0x127   : > { %3028 = vmatprep.subr.bf16.mxu1 %v4257_v10  ;;  %v4630_v10 = vpop.f32.mrf.mxu1 }
 0x129   : > { %2986 = vmatpush1.bf16.msra.mxu0 %v4252_v11  ;;  %v4326_v11 = vld [vmem:[#allocation3 + $0x904] ss:$16 sps:$4 sm:$0xff]  }
 0x12a   : > { %3029 = vmatpush1.bf16.msra.mxu1 %v4255_v12  ;;  %2987 = vmatprep.subr.bf16.mxu0 %v4260_v13  ;;  %v4329_v12 = vld [vmem:[#allocation3 + $0xb04] ss:$16 sps:$4 sm:$0xff]   ;;  %v4324_v13 = vld [vmem:[#allocation3 + $0x900] ss:$16 sps:$4 sm:$0xff]  }
 0x12b   : > { %3030 = vmatprep.subr.bf16.mxu1 %v4263_v14  ;;  %v4327_v14 = vld [vmem:[#allocation3 + $0xb00] ss:$16 sps:$4 sm:$0xff]  }
 0x12d   : > { %2988 = vmatpush1.bf16.msra.mxu0 %v4258_v15  ;;  %v2323_v15 = vrot.slane %v296_v1, 1  ;;  %v4371_v1 = vld [vmem:[#allocation3 + $0xa2c] ss:$16 sps:$4 sm:$0xff]  }
 0x12e   : > { %3031 = vmatpush1.bf16.msra.mxu1 %v4261_v16  ;;  %2989 = vmatprep.subr.bf16.mxu0 %v4266_v17  ;;  %v2324_v16 = vrot.slane %v300_v7, 1  ;;  %v2329_v17 = vrot.slane %v298_v21, 1  ;;  %v4374_v7 = vld [vmem:[#allocation3 + $0x80c] ss:$16 sps:$4 sm:$0xff]   ;;  %v4372_v21 = vld [vmem:[#allocation3 + $0x808] ss:$16 sps:$4 sm:$0xff]  }
 0x12f   : > { %3032 = vmatprep.subr.bf16.mxu1 %v4269_v18  ;;  %v2330_v18 = vrot.slane %v302_v22, 1  ;;  %v4375_v22 = vld [vmem:[#allocation3 + $0xa08] ss:$16 sps:$4 sm:$0xff]  }
 0x131   : > { %2990 = vmatpush1.bf16.msra.mxu0 %v4264_v19  ;;  %v4632_v19 = vpop.f32.mrf.mxu0 }
 0x132   : > { %3033 = vmatpush1.bf16.msra.mxu1 %v4267_v20  ;;  %2991 = vmatprep.subr.bf16.mxu0 %v4272_v23  ;;  %v4634_v20 = vpop.f32.mrf.mxu1  ;;  %v4332_v23 = vld [vmem:[#allocation3 + $0x8ec] ss:$16 sps:$4 sm:$0xff]  }
 0x133   : > { %3034 = vmatprep.subr.bf16.mxu1 %v4275_v24  ;;  %v4335_v24 = vld [vmem:[#allocation3 + $0xaec] ss:$16 sps:$4 sm:$0xff]  }
 0x135   : > { %2992 = vmatpush1.bf16.msra.mxu0 %v4270_v27  ;;  %v4637_v27 = vsel %vm2322_vm2, %v2323_v15, %v2324_v16  ;;  %v4386_v15 = vld [vmem:[#allocation3 + $0x9cc] ss:$16 sps:$4 sm:$0xff]  }
 0x136   : > { %3035 = vmatpush1.bf16.msra.mxu1 %v4273_v28  ;;  %2993 = vmatprep.subr.bf16.mxu0 %v4278_v29  ;;  %v4640_v28 = vsel %vm2322_vm2, %v2329_v17, %v2330_v18  ;;  %v4330_v29 = vld [vmem:[#allocation3 + $0x8e8] ss:$16 sps:$4 sm:$0xff]   ;;  %v4389_v16 = vld [vmem:[#allocation3 + $0xbcc] ss:$16 sps:$4 sm:$0xff]  }
 0x137   : > { %3036 = vmatprep.subr.bf16.mxu1 %v4281_v30  ;;  %v4333_v30 = vld [vmem:[#allocation3 + $0xae8] ss:$16 sps:$4 sm:$0xff]  }
 0x138   : > { %v4384_v17 = vld [vmem:[#allocation3 + $0x9c8] ss:$16 sps:$4 sm:$0xff]  }
 0x139   : > { %2994 = vmatpush1.bf16.msra.mxu0 %v4276_v33  ;;  %v4642_v33 = vpop.f32.mrf.mxu0  ;;  %v4387_v18 = vld [vmem:[#allocation3 + $0xbc8] ss:$16 sps:$4 sm:$0xff]  }
 0x13a   : > { %3037 = vmatpush1.bf16.msra.mxu1 %v4279_v34  ;;  %2995 = vmatprep.subr.bf16.mxu0 %v4284_v35  ;;  %v4644_v34 = vpop.f32.mrf.mxu1  ;;  %v4338_v35 = vld [vmem:[#allocation3 + $0x8cc] ss:$16 sps:$4 sm:$0xff]  }
 0x13b   : > { %3038 = vmatprep.subr.bf16.mxu1 %v4287_v36  ;;  %v4341_v36 = vld [vmem:[#allocation3 + $0xacc] ss:$16 sps:$4 sm:$0xff]  }
 0x13d   : > { %2996 = vmatpush2.bf16.msra.mxu0 %v4282_v37 }
 0x13e   : > { %3039 = vmatpush2.bf16.msra.mxu1 %v4285_v38  ;;  %2997 = vmatprep.subr.bf16.mxu0 %v4290_v39 }
 0x13f   : > { %3040 = vmatprep.subr.bf16.mxu1 %v4293_v40  ;;  %v4336_v40 = vld [vmem:[#allocation3 + $0x8c8] ss:$16 sps:$4 sm:$0xff]  }
 0x141   : > { %2998 = vmatpush2.bf16.msra.mxu0 %v4288_v41  ;;  %v4339_v41 = vld [vmem:[#allocation3 + $0xac8] ss:$16 sps:$4 sm:$0xff]  }
 0x142   : > { %3041 = vmatpush2.bf16.msra.mxu1 %v4291_v43  ;;  %2999 = vmatprep.subr.bf16.mxu0 %v4296_v44 }
 0x143   : > { %3042 = vmatprep.subr.bf16.mxu1 %v4299_v45  ;;  %v4344_v45 = vld [vmem:[#allocation3 + $0x8ac] ss:$16 sps:$4 sm:$0xff]  }
 0x145   : > { %3000 = vmatpush2.bf16.msra.mxu0 %v4294_v47  ;;  %v4347_v47 = vld [vmem:[#allocation3 + $0xaac] ss:$16 sps:$4 sm:$0xff]  }
 0x146   : > { %3043 = vmatpush2.bf16.msra.mxu1 %v4297_v48  ;;  %3001 = vmatprep.subr.bf16.mxu0 %v4302_v25 }
 0x147   : > { %3044 = vmatprep.subr.bf16.mxu1 %v4305_v49 }
 0x149   : > { %3002 = vmatpush2.bf16.msra.mxu0 %v4300_v26 }
 0x14a   : > { %3045 = vmatpush2.bf16.msra.mxu1 %v4303_v50  ;;  %3003 = vmatprep.subr.bf16.mxu0 %v4308_v51  ;;  %v4342_v50 = vld [vmem:[#allocation3 + $0x8a8] ss:$16 sps:$4 sm:$0xff]  }
 0x14b   : > { %3046 = vmatprep.subr.bf16.mxu1 %v4311_v31  ;;  %v4345_v51 = vld [vmem:[#allocation3 + $0xaa8] ss:$16 sps:$4 sm:$0xff]  }
 0x14d   : > { %3004 = vmatpush2.bf16.msra.mxu0 %v4306_v32 }
 0x14e   : > { %3047 = vmatpush2.bf16.msra.mxu1 %v4309_v52  ;;  %3005 = vmatprep.subr.bf16.mxu0 %v4314_v53  ;;  %v4350_v52 = vld [vmem:[#allocation3 + $0x88c] ss:$16 sps:$4 sm:$0xff]  }
 0x14f   : > { %3048 = vmatprep.subr.bf16.mxu1 %v4317_v54  ;;  %v4353_v53 = vld [vmem:[#allocation3 + $0xa8c] ss:$16 sps:$4 sm:$0xff]  }
 0x151   : > { %3006 = vmatpush2.bf16.msra.mxu0 %v4312_v55  ;;  %v4356_v55 = vld [vmem:[#allocation3 + $0x86c] ss:$16 sps:$4 sm:$0xff]  }
 0x152   : > { %3049 = vmatpush2.bf16.msra.mxu1 %v4315_v56  ;;  %3007 = vmatprep.subr.bf16.mxu0 %v4320_v57  ;;  %v4359_v56 = vld [vmem:[#allocation3 + $0xa6c] ss:$16 sps:$4 sm:$0xff]   ;;  %v4354_v57 = vld [vmem:[#allocation3 + $0x868] ss:$16 sps:$4 sm:$0xff]  }
 0x153   : > { %3050 = vmatprep.subr.bf16.mxu1 %v4323_v58  ;;  %v4357_v58 = vld [vmem:[#allocation3 + $0xa68] ss:$16 sps:$4 sm:$0xff]  }
 0x155   : > { %3008 = vmatpush2.bf16.msra.mxu0 %v4318_v4  ;;  %v4366_v4 = vld [vmem:[#allocation3 + $0x828] ss:$16 sps:$4 sm:$0xff]  }
 0x156   : > { %3051 = vmatpush2.bf16.msra.mxu1 %v4321_v5  ;;  %3009 = vmatprep.subr.bf16.mxu0 %v4326_v11  ;;  %v4369_v5 = vld [vmem:[#allocation3 + $0xa28] ss:$16 sps:$4 sm:$0xff]   ;;  %v4380_v11 = vld [vmem:[#allocation3 + $0x9ec] ss:$16 sps:$4 sm:$0xff]  }
 0x157   : > { %3052 = vmatprep.subr.bf16.mxu1 %v4329_v12  ;;  %v4383_v12 = vld [vmem:[#allocation3 + $0xbec] ss:$16 sps:$4 sm:$0xff]  }
 0x159   : > { %3010 = vmatpush2.bf16.msra.mxu0 %v4324_v13  ;;  %v4378_v13 = vld [vmem:[#allocation3 + $0x9e8] ss:$16 sps:$4 sm:$0xff]  }
 0x15a   : > { %3053 = vmatpush2.bf16.msra.mxu1 %v4327_v14  ;;  %3065 = vmatprep.subr.bf16.mxu0 %v4332_v23  ;;  %v4381_v14 = vld [vmem:[#allocation3 + $0xbe8] ss:$16 sps:$4 sm:$0xff]   ;;  %v4392_v23 = vld [vmem:[#allocation3 + $0x9ac] ss:$16 sps:$4 sm:$0xff]  }
 0x15b   : > { %3108 = vmatprep.subr.bf16.mxu1 %v4335_v24  ;;  %v4395_v24 = vld [vmem:[#allocation3 + $0xbac] ss:$16 sps:$4 sm:$0xff]  }
 0x15c   : > { %v1321_v37 = vpop.f32.mrf.mxu0  ;;  %3012 = vmatmul.mubr.bf16.vlgmr.msra.gmra.mxu0 %v4637_v27 }
 0x15d   : > { %v1364_v38 = vpop.f32.mrf.mxu1  ;;  %3055 = vmatmul.mubr.bf16.vlgmr.msra.gmra.mxu1 %v4640_v28  ;;  %3066 = vmatpush1.bf16.msra.mxu0 %v4330_v29  ;;  %v4390_v29 = vld [vmem:[#allocation3 + $0x9a8] ss:$16 sps:$4 sm:$0xff]  }
 0x15e   : > { %v4648_v39 = vadd.f32 %v1364_v38, %v1321_v37  ;;  %3109 = vmatpush1.bf16.msra.mxu1 %v4333_v30  ;;  %v1323_v43 = vpop.f32.mrf.mxu0  ;;  %3067 = vmatprep.subr.bf16.mxu0 %v4338_v35  ;;  %v4393_v30 = vld [vmem:[#allocation3 + $0xba8] ss:$16 sps:$4 sm:$0xff]   ;;  %v4398_v35 = vld [vmem:[#allocation3 + $0x98c] ss:$16 sps:$4 sm:$0xff]  }
 0x15f   : > { %v1366_v44 = vpop.f32.mrf.mxu1  ;;  %3110 = vmatprep.subr.bf16.mxu1 %v4341_v36  ;;  %3097 = vmatprep.mubr.bf16.mxu0 %v4617_v2  ;;  %v4348_v2 = vld [vmem:[#allocation3 + $0x888] ss:$16 sps:$4 sm:$0xff]   ;;  %v4401_v36 = vld [vmem:[#allocation3 + $0xb8c] ss:$16 sps:$4 sm:$0xff]  }
 0x160   : > { %v4650_v48 = vadd.f32 %v1366_v44, %v1323_v43  ;;  %3140 = vmatprep.mubr.bf16.mxu1 %v4620_v3  ;;  %v1325_v25 = vpop.f32.mrf.mxu0  ;;  %v4351_v3 = vld [vmem:[#allocation3 + $0xa88] ss:$16 sps:$4 sm:$0xff]  }
 0x161   : > { %v1368_v49 = vpop.f32.mrf.mxu1  ;;  %3068 = vmatpush1.bf16.msra.mxu0 %v4336_v40  ;;  %v4396_v37 = vld [vmem:[#allocation3 + $0x988] ss:$16 sps:$4 sm:$0xff]   ;;  %v4404_v40 = vld [vmem:[#allocation3 + $0x96c] ss:$16 sps:$4 sm:$0xff]  }
 0x162   : > { %v4654_v26 = vadd.f32 %v1368_v49, %v1325_v25  ;;  %3111 = vmatpush1.bf16.msra.mxu1 %v4339_v41  ;;  %v1327_v31 = vpop.f32.mrf.mxu0  ;;  %3069 = vmatprep.subr.bf16.mxu0 %v4344_v45  ;;  %v4399_v38 = vld [vmem:[#allocation3 + $0xb88] ss:$16 sps:$4 sm:$0xff]   ;;  %v4407_v41 = vld [vmem:[#allocation3 + $0xb6c] ss:$16 sps:$4 sm:$0xff]  }
 0x163   : > { %v1370_v32 = vpop.f32.mrf.mxu1  ;;  %3112 = vmatprep.subr.bf16.mxu1 %v4347_v47  ;;  %v4402_v43 = vld [vmem:[#allocation3 + $0x968] ss:$16 sps:$4 sm:$0xff]   ;;  %v4410_v45 = vld [vmem:[#allocation3 + $0x94c] ss:$16 sps:$4 sm:$0xff]  }
 0x164   : > { %v4656_v54 = vadd.f32 %v1370_v32, %v1327_v31  ;;  %v4405_v44 = vld [vmem:[#allocation3 + $0xb68] ss:$16 sps:$4 sm:$0xff]   ;;  %v4413_v47 = vld [vmem:[#allocation3 + $0xb4c] ss:$16 sps:$4 sm:$0xff]  }
 0x165   : > { %3070 = vmatpush1.bf16.msra.mxu0 %v4342_v50  ;;  %v4408_v25 = vld [vmem:[#allocation3 + $0x948] ss:$16 sps:$4 sm:$0xff]   ;;  %v4416_v50 = vld [vmem:[#allocation3 + $0x92c] ss:$16 sps:$4 sm:$0xff]  }
 0x166   : > { %3113 = vmatpush1.bf16.msra.mxu1 %v4345_v51  ;;  %3071 = vmatprep.subr.bf16.mxu0 %v4350_v52  ;;  %v4411_v49 = vld [vmem:[#allocation3 + $0xb48] ss:$16 sps:$4 sm:$0xff]   ;;  %v4419_v51 = vld [vmem:[#allocation3 + $0xb2c] ss:$16 sps:$4 sm:$0xff]  }
 0x167   : > { %3114 = vmatprep.subr.bf16.mxu1 %v4353_v53  ;;  %v4414_v31 = vld [vmem:[#allocation3 + $0x928] ss:$16 sps:$4 sm:$0xff]   ;;  %v4422_v52 = vld [vmem:[#allocation3 + $0x90c] ss:$16 sps:$4 sm:$0xff]  }
 0x168   : > { %v4417_v32 = vld [vmem:[#allocation3 + $0xb28] ss:$16 sps:$4 sm:$0xff]   ;;  %v4425_v53 = vld [vmem:[#allocation3 + $0xb0c] ss:$16 sps:$4 sm:$0xff]  }
 0x169   : > { %3072 = vmatpush1.bf16.msra.mxu0 %v4348_v2  ;;  %v4420_v2 = vld [vmem:[#allocation3 + $0x908] ss:$16 sps:$4 sm:$0xff]  }
 0x16a   : > { %3115 = vmatpush1.bf16.msra.mxu1 %v4351_v3  ;;  %3073 = vmatprep.subr.bf16.mxu0 %v4356_v55  ;;  %v4423_v3 = vld [vmem:[#allocation3 + $0xb08] ss:$16 sps:$4 sm:$0xff]  }
 0x16b   : > { %3116 = vmatprep.subr.bf16.mxu1 %v4359_v56 }
 0x16d   : > { %3074 = vmatpush1.bf16.msra.mxu0 %v4354_v57 }
 0x16e   : > { %3117 = vmatpush1.bf16.msra.mxu1 %v4357_v58  ;;  %3075 = vmatprep.subr.bf16.mxu0 %v4362_v59 }
 0x16f   : > { %3118 = vmatprep.subr.bf16.mxu1 %v4365_v46 }
 0x171   : > { %3076 = vmatpush1.bf16.msra.mxu0 %v4360_v61 }
 0x172   : > { %3119 = vmatpush1.bf16.msra.mxu1 %v4363_v62  ;;  %3077 = vmatprep.subr.bf16.mxu0 %v4368_v63 }
 0x173   : > { %3120 = vmatprep.subr.bf16.mxu1 %v4371_v1 }
 0x175   : > { %3078 = vmatpush1.bf16.msra.mxu0 %v4366_v4 }
 0x176   : > { %3121 = vmatpush1.bf16.msra.mxu1 %v4369_v5  ;;  %3079 = vmatprep.subr.bf16.mxu0 %v4374_v7 }
 0x177   : > { %3122 = vmatprep.subr.bf16.mxu1 %v4377_v8 }
 0x179   : > { %3080 = vmatpush1.bf16.msra.mxu0 %v4372_v21 }
 0x17a   : > { %3123 = vmatpush1.bf16.msra.mxu1 %v4375_v22  ;;  %3081 = vmatprep.subr.bf16.mxu0 %v4380_v11 }
 0x17b   : > { %3124 = vmatprep.subr.bf16.mxu1 %v4383_v12 }
 0x17d   : > { %3082 = vmatpush2.bf16.msra.mxu0 %v4378_v13 }
 0x17e   : > { %3125 = vmatpush2.bf16.msra.mxu1 %v4381_v14  ;;  %3083 = vmatprep.subr.bf16.mxu0 %v4386_v15 }
 0x17f   : > { %3126 = vmatprep.subr.bf16.mxu1 %v4389_v16 }
 0x181   : > { %3084 = vmatpush2.bf16.msra.mxu0 %v4384_v17  ;;  %v1283_v17 = vadd.f32 %v4634_v20, %v4632_v19 }
 0x182   : > { %3127 = vmatpush2.bf16.msra.mxu1 %v4387_v18  ;;  %3085 = vmatprep.subr.bf16.mxu0 %v4392_v23 }
 0x183   : > { %3128 = vmatprep.subr.bf16.mxu1 %v4395_v24 }
 0x185   : > { %3086 = vmatpush2.bf16.msra.mxu0 %v4390_v29 }
 0x186   : > { %3129 = vmatpush2.bf16.msra.mxu1 %v4393_v30  ;;  %3087 = vmatprep.subr.bf16.mxu0 %v4398_v35 }
 0x187   : > { %3130 = vmatprep.subr.bf16.mxu1 %v4401_v36 }
 0x189   : > { %3088 = vmatpush2.bf16.msra.mxu0 %v4396_v37 }
 0x18a   : > { %3131 = vmatpush2.bf16.msra.mxu1 %v4399_v38  ;;  %3089 = vmatprep.subr.bf16.mxu0 %v4404_v40 }
 0x18b   : > { %3132 = vmatprep.subr.bf16.mxu1 %v4407_v41 }
 0x18d   : > { %3090 = vmatpush2.bf16.msra.mxu0 %v4402_v43 }
 0x18e   : > { %3133 = vmatpush2.bf16.msra.mxu1 %v4405_v44  ;;  %3091 = vmatprep.subr.bf16.mxu0 %v4410_v45 }
 0x18f   : > { %3134 = vmatprep.subr.bf16.mxu1 %v4413_v47 }
 0x191   : > { %3092 = vmatpush2.bf16.msra.mxu0 %v4408_v25 }
 0x192   : > { %3135 = vmatpush2.bf16.msra.mxu1 %v4411_v49  ;;  %3093 = vmatprep.subr.bf16.mxu0 %v4416_v50 }
 0x193   : > { %3136 = vmatprep.subr.bf16.mxu1 %v4419_v51 }
 0x195   : > { %3094 = vmatpush2.bf16.msra.mxu0 %v4414_v31 }
 0x196   : > { %3137 = vmatpush2.bf16.msra.mxu1 %v4417_v32  ;;  %3095 = vmatprep.subr.bf16.mxu0 %v4422_v52 }
 0x197   : > { %3138 = vmatprep.subr.bf16.mxu1 %v4425_v53 }
 0x199   : > { %3096 = vmatpush2.bf16.msra.mxu0 %v4420_v2 }
 0x19a   : > { %3139 = vmatpush2.bf16.msra.mxu1 %v4423_v3 }
 0x19c   : > { %3098 = vmatmul.mubr.bf16.vlgmr.msra.gmra.mxu0 %v4637_v27  ;;  %v2047_v55 = vpop.f32.mrf.mxu0 }
 0x19d   : > { %3141 = vmatmul.mubr.bf16.vlgmr.msra.gmra.mxu1 %v4640_v28  ;;  %v2090_v56 = vpop.f32.mrf.mxu1 }
 0x19e   : > { %v2049_v57 = vpop.f32.mrf.mxu0 }
 0x19f   : > { %v2092_v58 = vpop.f32.mrf.mxu1 }
 0x1a0   : > { %v2051_v59 = vpop.f32.mrf.mxu0 }
 0x1a1   : > { %v2094_v46 = vpop.f32.mrf.mxu1  ;;  %v2052_v29 = vadd.f32 %v2051_v59, %v1283_v17 }
 0x1a2   : > { %v2053_v61 = vpop.f32.mrf.mxu0 }
 0x1a3   : > { %v2096_v62 = vpop.f32.mrf.mxu1  ;;  %v2095_v19 = vadd.f32 %v2094_v46, %v2052_v29 }
 0x1dc   : > { %v2133_v63 = vpop.f32.mrf.mxu0 }
 0x1dd   : > { %v2176_v1 = vpop.f32.mrf.mxu1  ;;  %v2134_v4 = vadd.f32 %v2133_v63, %v4648_v39  ;;  %v1279_v39 = vadd.f32 %v4626_v42, %v4624_v60 }
 0x1de   : > { %v2135_v5 = vpop.f32.mrf.mxu0 }
 0x1df   : > { %v2178_v7 = vpop.f32.mrf.mxu1  ;;  %v4661_v8 = vadd.f32 %v2176_v1, %v2134_v4  ;;  %v2136_v27 = vadd.f32 %v2135_v5, %v4650_v48  ;;  %v1281_v48 = vadd.f32 %v4630_v10, %v4628_v9 }
 0x1e0   : > { %v2137_v28 = vpop.f32.mrf.mxu0 }
 0x1e1   : > { %v2180_v21 = vpop.f32.mrf.mxu1  ;;  %v4664_v22 = vadd.f32 %v2178_v7, %v2136_v27  ;;  %v2138_v11 = vadd.f32 %v2137_v28, %v4654_v26  ;;  %v2048_v26 = vadd.f32 %v2047_v55, %v1279_v39  ;;  %v2050_v18 = vadd.f32 %v2049_v57, %v1281_v48 }
 0x1e2   : > { %v2139_v12 = vpop.f32.mrf.mxu0 }
 0x1e3   : > { %v4667_v13 = vadd.f32 %v2180_v21, %v2138_v11  ;;  %v2140_v14 = vadd.f32 %v2139_v12, %v4656_v54  ;;  %v2182_v15 = vpop.f32.mrf.mxu1  ;;  %v1285_v54 = vadd.f32 %v4644_v34, %v4642_v33  ;;  %v2091_v37 = vadd.f32 %v2090_v56, %v2048_v26 }
 0x1e4   : > { %v2093_v60 = vadd.f32 %v2092_v58, %v2050_v18 }
 0x1e5   : > { %v4670_v16 = vadd.f32 %v2182_v15, %v2140_v14  ;;  %v2054_v42 = vadd.f32 %v2053_v61, %v1285_v54 }
 0x1e7   : > { %v2097_v43 = vadd.f32 %v2096_v62, %v2054_v42 }
 0x21c   : > { %v3013_v23 = vpop.f32.mrf.mxu0 }
 0x21d   : > { %v3056_v24 = vpop.f32.mrf.mxu1 }
 0x21e   : > { %v3057_v30 = vadd.f32 %v3056_v24, %v3013_v23  ;;  %v3015_v35 = vpop.f32.mrf.mxu0 }
 0x21f   : > { %v3058_v36 = vpop.f32.mrf.mxu1 }
 0x220   : > { %v3059_v9 = vadd.f32 %v3058_v36, %v3015_v35  ;;  %v3017_v10 = vpop.f32.mrf.mxu0  ;;  %v3151_v20 = vadd.f32 %v3057_v30, %v2091_v37 }
 0x221   : > { %v3060_v38 = vpop.f32.mrf.mxu1 }
 0x222   : > { %v3152_v40 = vadd.f32 %v3059_v9, %v2093_v60  ;;  %v3061_v41 = vadd.f32 %v3060_v38, %v3017_v10  ;;  %v3019_v33 = vpop.f32.mrf.mxu0  ;;  %v3245_v25 = vmul.f32 %v3151_v20, %v3151_v20 }
 0x223   : > { %v3062_v34 = vpop.f32.mrf.mxu1 }
 0x224   : > { %v3823_v44 = vpack.c.bf16 %v3152_v40, %v3151_v20  ;;  %v3155_v45 = vadd.f32 %v3061_v41, %v2095_v19  ;;  %v3063_v47 = vadd.f32 %v3062_v34, %v3019_v33  ;;  %v3246_v2 = vmul.f32 %v3152_v40, %v3152_v40 }
 0x226   : > { %3183 = vst [vmem:[%s4684_s4] sm:$0xff] %v3823_v44  ;;  %v3187_v49 = vadd.f32 %v3155_v45, %v3151_v20  ;;  %v3249_v50 = vmul.f32 %v3155_v45, %v3155_v45  ;;  %v3156_v51 = vadd.f32 %v3063_v47, %v2097_v43 }
 0x228   : > { %v3188_v31 = vrot.slane %v3187_v49, 4  ;;  %v3253_v32 = vadd.f32 %v3249_v50, %v3245_v25  ;;  %v3825_v52 = vpack.c.bf16 %v3156_v51, %v3155_v45  ;;  %v3194_v53 = vadd.f32 %v3156_v51, %v3152_v40 }
 0x229   : > { %v3250_v3 = vmul.f32 %v3156_v51, %v3156_v51 }
 0x22a   : > { %v3189_v55 = vadd.f32 %v3188_v31, %v3187_v49  ;;  %v3254_v56 = vrot.slane %v3253_v32, 4  ;;  %3185 = vst [vmem:[%s4684_s4 + $0x10] sm:$0xff] %v3825_v52  ;;  %v3195_v57 = vrot.slane %v3194_v53, 4 }
 0x22b   : > { %v3260_v58 = vadd.f32 %v3250_v3, %v3246_v2 }
 0x22c   : > { %v3190_v59 = vrot.slane %v3189_v55, 2  ;;  %v3255_v46 = vadd.f32 %v3254_v56, %v3253_v32  ;;  %v3196_v61 = vadd.f32 %v3195_v57, %v3194_v53  ;;  %v4472_v32 = vmov 1966171168  }
 0x22d   : > { %v3261_v62 = vrot.slane %v3260_v58, 4  ;;  %v3222_v52 = vunpack.c.l.s4 %v4472_v32 }
 0x22e   : > { %v3191_v63 = vadd.f32 %v3190_v59, %v3189_v55  ;;  %v3256_v1 = vrot.slane %v3255_v46, 2  ;;  %v3197_v4 = vrot.slane %v3196_v61, 2 }
 0x22f   : > { %v3262_v5 = vadd.f32 %v3261_v62, %v3260_v58  ;;  %v3223_v58 = vunpack.c.0.s8 %v3222_v52 }
 0x230   : > { %v3192_v7 = vrot.slane %v3191_v63, 1  ;;  %v3257_v27 = vadd.f32 %v3256_v1, %v3255_v46  ;;  %v3198_v28 = vadd.f32 %v3197_v4, %v3196_v61  ;;  %v3225_v46 = vshrl.u32 %v202_v0, 7 }
 0x231   : > { %v3263_v21 = vrot.slane %v3262_v5, 2 }
 0x232   : > { %v3199_v11 = vrot.slane %v3198_v28, 1  ;;  %v3258_v12 = vrot.slane %v3257_v27, 1  ;;  %v4688_v15 = vadd.f32 %v3192_v7, %v3191_v63 }
 0x233   : > { %v3264_v14 = vadd.f32 %v3263_v21, %v3262_v5 }
 0x234   : > { %v4690_v39 = vadd.f32 %v3199_v11, %v3198_v28  ;;  %v4694_v26 = vadd.f32 %v3258_v12, %v3257_v27  ;;  %v3226_v27 = vsub.s32 %v3223_v58, %v3225_v46 }
 0x235   : > { %v3265_v48 = vrot.slane %v3264_v14, 1 }
 0x236   : > { %v3219_v17 = vcombine.low %v4688_v15, %v4690_v39 }
 0x237   : > { %v4696_v18 = vadd.f32 %v3265_v48, %v3264_v14 }
 0x238   : > { %v3227_v39 = vrot.slane %v3219_v17, %v3226_v27 }
 0x239   : > { %v3285_v23 = vcombine.low %v4694_v26, %v4696_v18 }
 0x25c   : > { %v3099_v24 = vpop.f32.mrf.mxu0 }
 0x25d   : > { %v3142_v54 = vpop.f32.mrf.mxu1 }
 0x25e   : > { %v3143_v29 = vadd.f32 %v3142_v54, %v3099_v24  ;;  %v3101_v30 = vpop.f32.mrf.mxu0  ;;  %v3293_v54 = vrot.slane %v3285_v23, %v3226_v27 }
 0x25f   : > { %v3144_v35 = vpop.f32.mrf.mxu1 }
 0x260   : > { %v3145_v36 = vadd.f32 %v3144_v35, %v3101_v30  ;;  %v3103_v37 = vpop.f32.mrf.mxu0  ;;  %v3153_v42 = vadd.f32 %v3143_v29, %v4661_v8 }
 0x261   : > { %v3146_v60 = vpop.f32.mrf.mxu1 }
 0x262   : > { %v3154_v9 = vadd.f32 %v3145_v36, %v4664_v22  ;;  %v3147_v10 = vadd.f32 %v3146_v60, %v3103_v37  ;;  %v3105_v38 = vpop.f32.mrf.mxu0  ;;  %v3247_v33 = vmul.f32 %v3153_v42, %v3153_v42 }
 0x263   : > { %v3148_v19 = vpop.f32.mrf.mxu1 }
 0x264   : > { %v3824_v20 = vpack.c.bf16 %v3154_v9, %v3153_v42  ;;  %v3157_v40 = vadd.f32 %v3147_v10, %v4667_v13  ;;  %v3149_v41 = vadd.f32 %v3148_v19, %v3105_v38  ;;  %v3248_v49 = vmul.f32 %v3154_v9, %v3154_v9 }
 0x266   : > { %3184 = vst [vmem:[%s4684_s4 + $0x8] sm:$0xff] %v3824_v20  ;;  %v3201_v34 = vadd.f32 %v3157_v40, %v3153_v42  ;;  %v3251_v43 = vmul.f32 %v3157_v40, %v3157_v40  ;;  %v3158_v44 = vadd.f32 %v3149_v41, %v4670_v16 }
 0x268   : > { %v3202_v45 = vrot.slane %v3201_v34, 4  ;;  %v3267_v47 = vadd.f32 %v3251_v43, %v3247_v33  ;;  %v3826_v25 = vpack.c.bf16 %v3158_v44, %v3157_v40  ;;  %v3208_v8 = vadd.f32 %v3158_v44, %v3154_v9 }
 0x269   : > { %v3252_v22 = vmul.f32 %v3158_v44, %v3158_v44 }
 0x26a   : > { %v3203_v50 = vadd.f32 %v3202_v45, %v3201_v34  ;;  %v3268_v51 = vrot.slane %v3267_v47, 4  ;;  %3186 = vst [vmem:[%s4684_s4 + $0x18] sm:$0xff] %v3826_v25  ;;  %v3209_v31 = vrot.slane %v3208_v8, 4 }
 0x26b   : > { %v3274_v13 = vadd.f32 %v3252_v22, %v3248_v49 }
 0x26c   : > { %v3204_v53 = vrot.slane %v3203_v50, 2  ;;  %v3269_v2 = vadd.f32 %v3268_v51, %v3267_v47  ;;  %v3210_v3 = vadd.f32 %v3209_v31, %v3208_v8 }
 0x26d   : > { %v3275_v55 = vrot.slane %v3274_v13, 4 }
 0x26e   : > { %v3205_v56 = vadd.f32 %v3204_v53, %v3203_v50  ;;  %v3270_v57 = vrot.slane %v3269_v2, 2  ;;  %v3211_v16 = vrot.slane %v3210_v3, 2 }
 0x26f   : > { %v3276_v59 = vadd.f32 %v3275_v55, %v3274_v13 }
 0x270   : > { %v3206_v61 = vrot.slane %v3205_v56, 1  ;;  %v3271_v62 = vadd.f32 %v3270_v57, %v3269_v2  ;;  %v3212_v63 = vadd.f32 %v3211_v16, %v3210_v3 }
 0x271   : > { %v3277_v1 = vrot.slane %v3276_v59, 2 }
 0x272   : > { %v3213_v4 = vrot.slane %v3212_v63, 1  ;;  %v3272_v5 = vrot.slane %v3271_v62, 1  ;;  %v3207_v28 = vadd.f32 %v3206_v61, %v3205_v56 }
 0x273   : > { %v3278_v7 = vadd.f32 %v3277_v1, %v3276_v59 }
 0x274   : > { %v3214_v21 = vadd.f32 %v3213_v4, %v3212_v63  ;;  %v3273_v14 = vadd.f32 %v3272_v5, %v3271_v62 }
 0x275   : > { %v3279_v11 = vrot.slane %v3278_v7, 1 }
 0x276   : > { %v3220_v12 = vcombine.low %v3207_v28, %v3214_v21 }
 0x277   : > { %v3280_v15 = vadd.f32 %v3279_v11, %v3278_v7 }
 0x278   : > { %v3234_v48 = vrot.slane %v3220_v12, %v3226_v27 }
 0x279   : > { %v3286_v24 = vcombine.low %v3273_v14, %v3280_v15 }
 0x27a   : > { %v3235_v0 = vcombine.low %v3227_v39, %v3234_v48 }
 0x27b   : > { %v3300_v29 = vrot.slane %v3286_v24, %v3226_v27 }
 0x27c   : > { %v3242_v30 = vrot.slane %v3235_v0, %v3226_v27 }
 0x27d   : > { %v3301_v35 = vcombine.low %v3293_v54, %v3300_v29 }
 0x27e   : > { %3244 = vst.msk [vmem:[%s201_s8] ss:$2 sm:$0xf] %vm4556_vm0, %v3242_v30 }
 0x27f   : > { %v3308_v36 = vrot.slane %v3301_v35, %v3226_v27 }
 0x281   : > { %3817 = vst.msk [vmem:[%s201_s8 + $0x1] ss:$2 sm:$0xf] %vm4556_vm0, %v3308_v36 }
 0x282 PF: > { %s15_s12 = sadd.s32 1, %s4466_s12  }
 0x283   : > { %p12_p2 = scmp.ge.s32.totalorder %s15_s12, 4  }
 0x285   :  { %14 = sbr.rel (!%p12_p2) target bundleno = 1 (0x1), region = 79 }
 0x28a   :  { %3352 = vsyncpa [#allocation4], 1 }
 0x28b   :  { %3354 = vsyncpa [#allocation4 + $0x1], 1 }

</bundles_post_ra>
